<compile_context>
chip_gen: v5e
topology: v5e:2x2
jax: 0.10.0
libtpu: 0.0.40
codegen_flags: <defaults>
</compile_context>

<pallas_src>
import functools
import math

import jax
import jax.numpy as jnp
from jax import lax
from jax.experimental import pallas as pl
from jax.experimental.pallas import tpu as pltpu


def _round_up(n, m):
    return ((n + m - 1) // m) * m


def _gelu_tanh(h):
    # tanh-approximate GELU computed in f32 (EUP tanh).
    # TODO(synk): torch nn.GELU() default is the exact erf form; the tanh
    # approximation deviates by <~1e-3 absolute (no erf lowering used here).
    c = math.sqrt(2.0 / math.pi)
    return 0.5 * h * (1.0 + jnp.tanh(c * (h + 0.044715 * (h * h * h))))


def _tcl_kernel(x_ref, wc_ref, bc_ref, wp_ref, bp_ref, o_ref):
    # x_ref : (bb, T, C)  bf16   streamed activations (whole sequences)
    # wc_ref: (C, 3*Hp)   bf16   [tap(t-1) | tap(t) | tap(t+1)] conv weights
    # bc_ref: (1, Hp)     f32    conv bias (H zero-padded to Hp lanes)
    # wp_ref: (Hp, C)     bf16   proj_back weight, pre-transposed
    # bp_ref: (1, C)      f32    proj_back bias
    # o_ref : (bb, T, C)  out dtype
    bb, T, C = x_ref.shape
    Hp = bc_ref.shape[1]
    rows = bb * T

    x = x_ref[...].reshape(rows, C)

    # All three conv taps in a single MXU GEMM with f32 accumulation.
    g = jnp.dot(x, wc_ref[...], preferred_element_type=jnp.float32)  # (rows, 3*Hp)
    g0 = g[:, 0 * Hp:1 * Hp]   # contribution of x[t-1]
    g1 = g[:, 1 * Hp:2 * Hp]   # contribution of x[t]
    g2 = g[:, 2 * Hp:3 * Hp]   # contribution of x[t+1]

    # +/-1 time shifts with per-sequence replicate padding.  The cyclic roll
    # crosses sequence boundaries only at rows t==0 / t==T-1, which are exactly
    # the rows overwritten by the replicate-pad fixup below.
    t_idx = lax.broadcasted_iota(jnp.int32, (bb, T, Hp), 1).reshape(rows, Hp)
    g0s = jnp.where(t_idx == 0, g0, pltpu.roll(g0, shift=1, axis=0))
    g2s = jnp.where(t_idx == T - 1, g2, pltpu.roll(g2, shift=rows - 1, axis=0))

    h = g0s + g1 + g2s + bc_ref[...].astype(jnp.float32)              # (rows, Hp) f32
    h = _gelu_tanh(h)
    # TODO(synk): dropout is identity here (inference mode); a training-mode
    # kernel would draw a keep-mask with pltpu.prng_seed + stateful_bernoulli.

    hf = h.astype(wp_ref.dtype)
    y = jnp.dot(hf, wp_ref[...], preferred_element_type=jnp.float32)  # (rows, C)
    y = y + bp_ref[...].astype(jnp.float32)
    o_ref[...] = y.reshape(bb, T, C).astype(o_ref.dtype)


def _pick_batch_block(B, T, target_rows, min_steps):
    """Largest divisor of B with ~target_rows rows/tile and >= min_steps grid steps."""
    bb = max(1, min(B, max(1, target_rows // max(T, 1))))
    while B % bb != 0:
        bb -= 1
    while bb > 1 and (B // bb) < min_steps:
        bb -= 1
        while B % bb != 0:
            bb -= 1
    return bb


@functools.partial(jax.jit, static_argnames=("target_rows",))
def temporal_conv_layer(x, conv_w, conv_b, proj_w, proj_b, *, target_rows=4096):
    """Forward of TemporalConvolutionalLayer (eval mode).

    x:      (B, T, C)
    conv_w: (2C, C, 3), conv_b: (2C,)   [nn.Conv1d layout]
    proj_w: (C, 2C),    proj_b: (C,)    [nn.Linear layout]
    returns (B, T, C)
    """
    B, T, C = x.shape
    H = conv_w.shape[0]                 # 2C
    assert conv_w.shape == (H, C, 3)
    assert proj_w.shape == (C, H)

    compute_dtype = jnp.bfloat16
    Hp = _round_up(H, 128)              # lane-dense hidden dim

    # conv weight (H, C, 3) -> one (C, 3*Hp) tap-major matrix (zero-padded in H).
    taps = [conv_w[:, :, k].T for k in range(3)]                    # (C, H) each
    if Hp != H:
        taps = [jnp.pad(w, ((0, 0), (0, Hp - H))) for w in taps]
    wc = jnp.concatenate(taps, axis=1).astype(compute_dtype)        # (C, 3*Hp)

    bc = conv_b if Hp == H else jnp.pad(conv_b, (0, Hp - H))
    bc = bc.reshape(1, Hp).astype(jnp.float32)

    wp = proj_w.T                                                   # (H, C)
    if Hp != H:
        wp = jnp.pad(wp, ((0, Hp - H), (0, 0)))
    wp = wp.astype(compute_dtype)                                   # (Hp, C)
    bp = proj_b.reshape(1, C).astype(jnp.float32)

    xb = x.astype(compute_dtype)

    bb = _pick_batch_block(B, T, target_rows, min_steps=4)
    grid = (B // bb,)
    M = B * T

    in_bytes = jnp.dtype(compute_dtype).itemsize
    out_bytes = jnp.dtype(x.dtype).itemsize
    flops = 2 * M * C * (3 * Hp) + 2 * M * Hp * C
    bytes_accessed = (M * C * in_bytes + M * C * out_bytes
                      + (C * 3 * Hp + Hp * C) * in_bytes + (Hp + C) * 4)

    out = pl.pallas_call(
        _tcl_kernel,
        out_shape=jax.ShapeDtypeStruct((B, T, C), x.dtype),
        grid_spec=pltpu.PrefetchScalarGridSpec(
            num_scalar_prefetch=0,
            grid=grid,
            in_specs=[
                pl.BlockSpec((bb, T, C), lambda i: (i, 0, 0)),      # activations
                pl.BlockSpec((C, 3 * Hp), lambda i: (0, 0)),        # conv taps
                pl.BlockSpec((1, Hp), lambda i: (0, 0)),            # conv bias
                pl.BlockSpec((Hp, C), lambda i: (0, 0)),            # proj weight
                pl.BlockSpec((1, C), lambda i: (0, 0)),             # proj bias
            ],
            out_specs=pl.BlockSpec((bb, T, C), lambda i: (i, 0, 0)),
        ),
        compiler_params=pltpu.CompilerParams(
            dimension_semantics=("parallel",),
            vmem_limit_bytes=32 * 1024 * 1024,
        ),
        cost_estimate=pl.CostEstimate(
            flops=flops,
            transcendentals=M * Hp,
            bytes_accessed=bytes_accessed,
        ),
    )(xb, wc, bc, wp, bp)

    return out


def _reference(x, conv_w, conv_b, proj_w, proj_b):
    """Pure-JAX f32 reference of the same forward (eval mode, tanh GELU)."""
    B, T, C = x.shape
    x_pad = jnp.concatenate([x[:, :1, :], x, x[:, -1:, :]], axis=1)
    h = (
        jnp.einsum("bti,oi->bto", x_pad[:, 0:T], conv_w[:, :, 0])
        + jnp.einsum("bti,oi->bto", x_pad[:, 1:T + 1], conv_w[:, :, 1])
        + jnp.einsum("bti,oi->bto", x_pad[:, 2:T + 2], conv_w[:, :, 2])
        + conv_b
    )
    h = _gelu_tanh(h)
    return h @ proj_w.T + proj_b


if __name__ == "__main__":
    key = jax.random.PRNGKey(0)
    k_x, k_cw, k_cb, k_pw, k_pb = jax.random.split(key, 5)

    batch, seq, cov_emb = 8, 128, 32            # M = 1024, grid = (4,) row tiles
    C, H = cov_emb, 2 * cov_emb

    # Deterministic parameter init mimicking torch defaults.
    conv_bound = 1.0 / math.sqrt(C * 3)         # Conv1d: U(-1/sqrt(in*k), +)
    conv_w = jax.random.uniform(k_cw, (H, C, 3), jnp.float32, -conv_bound, conv_bound)
    conv_b = jax.random.uniform(k_cb, (H,), jnp.float32, -conv_bound, conv_bound)
    proj_bound = 1.0 / math.sqrt(H)             # Linear: U(-1/sqrt(in), +)
    proj_w = jax.random.uniform(k_pw, (C, H), jnp.float32, -proj_bound, proj_bound)
    proj_b = jax.random.uniform(k_pb, (C,), jnp.float32, -proj_bound, proj_bound)

    x = jax.random.normal(k_x, (batch, seq, C), jnp.float32)

    y = temporal_conv_layer(x, conv_w, conv_b, proj_w, proj_b)
    jax.block_until_ready(y)

    y_ref = _reference(x, conv_w, conv_b, proj_w, proj_b)
    assert y.shape == (batch, seq, C)
    max_err = float(jnp.max(jnp.abs(y - y_ref)))
    # bf16 MXU operands with f32 accumulation vs the pure-f32 reference.
    assert max_err < 3e-2, f"max abs err {max_err}"

    print("KERNEL_OK")
</pallas_src>

<mosaic_0001>
module attributes {stable_mosaic.version = 11 : i64} {
  func.func @_tcl_kernel(%arg0: i32, %arg1: memref<2x128x32xbf16, #tpu.memory_space<vmem>>, %arg2: memref<32x384xbf16, #tpu.memory_space<vmem>>, %arg3: memref<1x128xf32, #tpu.memory_space<vmem>>, %arg4: memref<128x32xbf16, #tpu.memory_space<vmem>>, %arg5: memref<1x32xf32, #tpu.memory_space<vmem>>, %arg6: memref<2x128x32xf32, #tpu.memory_space<vmem>>) attributes {dimension_semantics = [#tpu.dimension_semantics<parallel>], iteration_bounds = array<i64: 4>, scalar_prefetch = 0 : i64, scratch_operands = 0 : i64, tpu.core_type = #tpu.core_type<tc>, window_params = [{transform_indices = @transform_0, window_bounds = array<i64: 2, 128, 32>}, {pipeline_mode = #tpu.pipeline_mode<synchronous>, transform_indices = @transform_1, window_bounds = array<i64: 32, 384>}, {pipeline_mode = #tpu.pipeline_mode<synchronous>, transform_indices = @transform_2, window_bounds = array<i64: 1, 128>}, {pipeline_mode = #tpu.pipeline_mode<synchronous>, transform_indices = @transform_3, window_bounds = array<i64: 128, 32>}, {pipeline_mode = #tpu.pipeline_mode<synchronous>, transform_indices = @transform_4, window_bounds = array<i64: 1, 32>}, {transform_indices = @transform_5, window_bounds = array<i64: 2, 128, 32>}]} {
    %c0 = arith.constant 0 : index
    %c0_0 = arith.constant 0 : index
    %c0_1 = arith.constant 0 : index
    %0 = vector.load %arg1[%c0, %c0_0, %c0_1] : memref<2x128x32xbf16, #tpu.memory_space<vmem>>, vector<2x128x32xbf16>
    %1 = vector.shape_cast %0 : vector<2x128x32xbf16> to vector<256x32xbf16>
    %c0_2 = arith.constant 0 : index
    %c0_3 = arith.constant 0 : index
    %2 = vector.load %arg2[%c0_2, %c0_3] : memref<32x384xbf16, #tpu.memory_space<vmem>>, vector<32x384xbf16>
    %cst = arith.constant dense<0.000000e+00> : vector<256x384xf32>
    %3 = tpu.matmul %1, %2, %cst {dimension_numbers = #tpu.dot_dimension_numbers<[1], [0], [0], [1], [0, 0, 1, 1], [], []>} : vector<256x32xbf16>, vector<32x384xbf16>, vector<256x384xf32> -> vector<256x384xf32>
    %4 = vector.extract_strided_slice %3 {offsets = [0, 0], sizes = [256, 128], strides = [1, 1]} : vector<256x384xf32> to vector<256x128xf32>
    %5 = vector.extract_strided_slice %3 {offsets = [0, 128], sizes = [256, 128], strides = [1, 1]} : vector<256x384xf32> to vector<256x128xf32>
    %6 = vector.extract_strided_slice %3 {offsets = [0, 256], sizes = [256, 128], strides = [1, 1]} : vector<256x384xf32> to vector<256x128xf32>
    %7 = tpu.iota {dimensions = array<i32: 1>} : vector<2x128x128xi32>
    %8 = vector.shape_cast %7 : vector<2x128x128xi32> to vector<256x128xi32>
    %c0_i32 = arith.constant 0 : i32
    %9 = vector.broadcast %c0_i32 : i32 to vector<256x128xi32>
    %10 = arith.cmpi eq, %8, %9 : vector<256x128xi32>
    %c1_i32 = arith.constant 1 : i32
    %11 = tpu.dynamic_rotate %4 by %c1_i32 dim 0 : vector<256x128xf32>, i32 -> vector<256x128xf32>
    %12 = arith.select %10, %4, %11 : vector<256x128xi1>, vector<256x128xf32>
    %c127_i32 = arith.constant 127 : i32
    %13 = vector.broadcast %c127_i32 : i32 to vector<256x128xi32>
    %14 = arith.cmpi eq, %8, %13 : vector<256x128xi32>
    %c255_i32 = arith.constant 255 : i32
    %15 = tpu.dynamic_rotate %6 by %c255_i32 dim 0 : vector<256x128xf32>, i32 -> vector<256x128xf32>
    %16 = arith.select %14, %6, %15 : vector<256x128xi1>, vector<256x128xf32>
    %17 = arith.addf %12, %5 : vector<256x128xf32>
    %18 = arith.addf %17, %16 : vector<256x128xf32>
    %c0_4 = arith.constant 0 : index
    %c0_5 = arith.constant 0 : index
    %19 = vector.load %arg3[%c0_4, %c0_5] : memref<1x128xf32, #tpu.memory_space<vmem>>, vector<1x128xf32>
    %20 = vector.broadcast %19 : vector<1x128xf32> to vector<256x128xf32>
    %21 = arith.addf %18, %20 : vector<256x128xf32>
    %cst_6 = arith.constant 5.000000e-01 : f32
    %22 = vector.broadcast %cst_6 : f32 to vector<256x128xf32>
    %23 = arith.mulf %22, %21 : vector<256x128xf32>
    %24 = arith.mulf %21, %21 : vector<256x128xf32>
    %25 = arith.mulf %24, %21 : vector<256x128xf32>
    %cst_7 = arith.constant 4.471500e-02 : f32
    %26 = vector.broadcast %cst_7 : f32 to vector<256x128xf32>
    %27 = arith.mulf %26, %25 : vector<256x128xf32>
    %28 = arith.addf %21, %27 : vector<256x128xf32>
    %cst_8 = arith.constant 0.797884583 : f32
    %29 = vector.broadcast %cst_8 : f32 to vector<256x128xf32>
    %30 = arith.mulf %29, %28 : vector<256x128xf32>
    %31 = math.tanh %30 : vector<256x128xf32>
    %cst_9 = arith.constant 1.000000e+00 : f32
    %32 = vector.broadcast %cst_9 : f32 to vector<256x128xf32>
    %33 = arith.addf %32, %31 : vector<256x128xf32>
    %34 = arith.mulf %23, %33 : vector<256x128xf32>
    %35 = arith.truncf %34 : vector<256x128xf32> to vector<256x128xbf16>
    %c0_10 = arith.constant 0 : index
    %c0_11 = arith.constant 0 : index
    %36 = vector.load %arg4[%c0_10, %c0_11] : memref<128x32xbf16, #tpu.memory_space<vmem>>, vector<128x32xbf16>
    %cst_12 = arith.constant dense<0.000000e+00> : vector<256x32xf32>
    %37 = tpu.matmul %35, %36, %cst_12 {dimension_numbers = #tpu.dot_dimension_numbers<[1], [0], [0], [1], [0, 0, 1, 1], [], []>} : vector<256x128xbf16>, vector<128x32xbf16>, vector<256x32xf32> -> vector<256x32xf32>
    %c0_13 = arith.constant 0 : index
    %c0_14 = arith.constant 0 : index
    %38 = vector.load %arg5[%c0_13, %c0_14] : memref<1x32xf32, #tpu.memory_space<vmem>>, vector<1x32xf32>
    %39 = vector.broadcast %38 : vector<1x32xf32> to vector<256x32xf32>
    %40 = arith.addf %37, %39 : vector<256x32xf32>
    %41 = vector.shape_cast %40 : vector<256x32xf32> to vector<2x128x32xf32>
    %c0_15 = arith.constant 0 : index
    %c0_16 = arith.constant 0 : index
    %c0_17 = arith.constant 0 : index
    %42 = vector.load %arg6[%c0_15, %c0_16, %c0_17] : memref<2x128x32xf32, #tpu.memory_space<vmem>>, vector<2x128x32xf32>
    tpu.vector_store %arg6[%c0_15, %c0_16, %c0_17], %41 {strides = array<i32>} : memref<2x128x32xf32, #tpu.memory_space<vmem>>, vector<2x128x32xf32>,
    return
  }
  func.func @transform_0(%arg0: i32) -> (i32, i32, i32) {
    %c0_i32 = arith.constant 0 : i32
    %c0_i32_0 = arith.constant 0 : i32
    %c0_i32_1 = arith.constant 0 : i32
    return %arg0, %c0_i32, %c0_i32_0 : i32, i32, i32
  }
  func.func @transform_1(%arg0: i32) -> (i32, i32) {
    %c0_i32 = arith.constant 0 : i32
    %c0_i32_0 = arith.constant 0 : i32
    %c0_i32_1 = arith.constant 0 : i32
    return %c0_i32, %c0_i32_0 : i32, i32
  }
  func.func @transform_2(%arg0: i32) -> (i32, i32) {
    %c0_i32 = arith.constant 0 : i32
    %c0_i32_0 = arith.constant 0 : i32
    %c0_i32_1 = arith.constant 0 : i32
    return %c0_i32, %c0_i32_0 : i32, i32
  }
  func.func @transform_3(%arg0: i32) -> (i32, i32) {
    %c0_i32 = arith.constant 0 : i32
    %c0_i32_0 = arith.constant 0 : i32
    %c0_i32_1 = arith.constant 0 : i32
    return %c0_i32, %c0_i32_0 : i32, i32
  }
  func.func @transform_4(%arg0: i32) -> (i32, i32) {
    %c0_i32 = arith.constant 0 : i32
    %c0_i32_0 = arith.constant 0 : i32
    %c0_i32_1 = arith.constant 0 : i32
    return %c0_i32, %c0_i32_0 : i32, i32
  }
  func.func @transform_5(%arg0: i32) -> (i32, i32, i32) {
    %c0_i32 = arith.constant 0 : i32
    %c0_i32_0 = arith.constant 0 : i32
    %c0_i32_1 = arith.constant 0 : i32
    return %arg0, %c0_i32, %c0_i32_0 : i32, i32, i32
  }
}

</mosaic_0001>

<bundles_post_ra>
// kernel: temporal_conv_layer.1
= control target key start
LH: loop header
LB: loop body
LE: loop exit
PB: predicated region body
PF: predicated region fallthrough
CT: control target
= control target key end

     0   :  { %s1930_s18 = smov 0   ;;  %s2533_s0 = inlined_call_operand.vmem [shape: bf16[8,128,32], index: 0, kind: input, shape index: {}]   ;;  %s2534_s1 = inlined_call_operand.vmem [shape: bf16[32,384], index: 1, kind: input, shape index: {}]   ;;  %s2535_s2 = inlined_call_operand.vmem [shape: f32[1,128], index: 2, kind: input, shape index: {}]   ;;  %s2536_s3 = inlined_call_operand.vmem [shape: bf16[128,32], index: 3, kind: input, shape index: {}]   ;;  %s2537_s4 = inlined_call_operand.vmem [shape: f32[1,32], index: 4, kind: input, shape index: {}]   ;;  %s2538_s5 = inlined_call_operand.vmem [shape: f32[8,128,32], index: 5, kind: output, shape index: {}]  }
   0x1 LB: > { %s1596_s19 = sadd.s32 4294967295, %s1898_s18   ;;  %p1600_p0 = scmp.ge.s32.totalorder %s1898_s18, 1  ;;  %s1898_s18 = sphi %s1930_s18, %s15_s18  }
   0x2   : > { %p189_p1 = scmp.lt.s32.totalorder %s1898_s18, 5 }
   0x4   : > { %p190_p2 = pnand %p1600_p0, %p189_p1 }
   0x5   : > { %s1601_s15 = sshll.u32 (!%p190_p2), %s1596_s19, 1 }
   0x6   : > { %193 = sbr.rel (%p190_p2) target bundleno = 584 (0x248), region = 40  ;;  %p220_p3 = scmp.lt.s32.totalorder (!%p190_p2), %s1601_s15, 7 }
   0xb   : > { %v1685_v0 = vld [vmem:[%s2534_s1 + $0x18] sm:$0xf]  ;;  %v1799_v1 = vld [vmem:[%s2534_s1 + $0x20] sm:$0xf0]  ;;  %v1693_v2 = vld [vmem:[%s2534_s1 + $0x20] sm:$0xf]  ;;  %v702_v28 = vlaneseq }
   0xc   : > { %v1686_v3 = vor.u32 %v1799_v1, %v1685_v0  ;;  %v1800_v4 = vld [vmem:[%s2534_s1 + $0x28] sm:$0xf0]  ;;  %v1798_v5 = vld [vmem:[%s2534_s1 + $0x1c] sm:$0xf]  ;;  %v1687_v6 = vld [vmem:[%s2534_s1 + $0x24] sm:$0xf0] }
   0xd   : > { %v1694_v7 = vor.u32 %v1800_v4, %v1693_v2  ;;  %v1690_v8 = vor.u32 %v1798_v5, %v1687_v6  ;;  %v1673_v9 = vld [vmem:[%s2534_s1] sm:$0xf]  ;;  %v1796_v10 = vld [vmem:[%s2534_s1 + $0x8] sm:$0xf0]  ;;  %v1681_v11 = vld [vmem:[%s2534_s1 + $0x8] sm:$0xf] }
   0xe   : > { %441 = vmatpush.bf16.msra.mxu0 %v1686_v3  ;;  %v1674_v12 = vor.u32 %v1796_v10, %v1673_v9  ;;  %v1797_v13 = vld [vmem:[%s2534_s1 + $0x10] sm:$0xf0]  ;;  %v1795_v14 = vld [vmem:[%s2534_s1 + $0x4] sm:$0xf]  ;;  %v1675_v16 = vld [vmem:[%s2534_s1 + $0xc] sm:$0xf0] }
   0xf   : > { %619 = vmatpush.bf16.msra.mxu2 %v1694_v7  ;;  %530 = vmatpush.bf16.msra.mxu1 %v1690_v8  ;;  %v1682_v15 = vor.u32 %v1797_v13, %v1681_v11  ;;  %v1678_v17 = vor.u32 %v1795_v14, %v1675_v16  ;;  %s2540_s15 = smov (!%p220_p3, %s1601_s15), 7  ;;  %vm386_vm0 = vcmask 261120   ;;  %v2022_v30 = vshrl.u32 %v702_v28, 7  ;;  %v1808_v31 = vld [vmem:[%s2536_s3 + $0x38] sm:$0xff]  ;;  %v1807_v35 = vld [vmem:[%s2536_s3 + $0x30] sm:$0xff]  ;;  %v1806_v40 = vld [vmem:[%s2536_s3 + $0x28] sm:$0xff] }
  0x10   : > { %s1777_s22 = sshll.u32 %s2540_s15, 6  ;;  %1809 = vmatpush.bf16.msra.mxu3 %v1808_v31  ;;  %v1805_v46 = vld [vmem:[%s2536_s3 + $0x20] sm:$0xff]  ;;  %v1804_v49 = vld [vmem:[%s2536_s3 + $0x18] sm:$0xff]  ;;  %v1803_v53 = vld [vmem:[%s2536_s3 + $0x10] sm:$0xff]  ;;  %s1778_s21 = sshll.u32 %s2540_s15, 7 }
  0x11   : > { %s1980_s24 = scalar_lea.vmem %s2533_s0, %s1777_s22  ;;  %vm767_vm1 = vcmp.lt.s32.totalorder %v2022_v30, 1  ;;  %vm880_vm2 = vcmp.lt.s32.totalorder %v2022_v30, 7  ;;  %v1802_v58 = vld [vmem:[%s2536_s3 + $0x8] sm:$0xff]  ;;  %v1801_v1 = vld [vmem:[%s2536_s3] sm:$0xff]  ;;  %vm719_vm4 = vcmp.eq.s32.totalorder %v2022_v30, 0  ;;  %s2308_s25 = scalar_lea.vmem %s2538_s5, %s1778_s21 }
  0x12   : > { %442 = vmatpush.bf16.msra.mxu0 %v1674_v12  ;;  %v1779_v18 = vld [vmem:[%s1980_s24] sm:$0xff]  ;;  %v1780_v19 = vld [vmem:[%s1980_s24 + $0x8] sm:$0xff]  ;;  %v1781_v20 = vld [vmem:[%s1980_s24 + $0x10] sm:$0xff] }
  0x13   : > { %620 = vmatpush.bf16.msra.mxu2 %v1682_v15  ;;  %531 = vmatpush.bf16.msra.mxu1 %v1678_v17  ;;  %v1782_v21 = vld [vmem:[%s1980_s24 + $0x18] sm:$0xff]  ;;  %v1783_v22 = vld [vmem:[%s1980_s24 + $0x20] sm:$0xff]  ;;  %v1784_v23 = vld [vmem:[%s1980_s24 + $0x28] sm:$0xff] }
  0x14   : > { %v1785_v24 = vld [vmem:[%s1980_s24 + $0x30] sm:$0xff]  ;;  %v1786_v25 = vld [vmem:[%s1980_s24 + $0x38] sm:$0xff]  ;;  %v1787_v26 = vld [vmem:[%s1980_s24 + $0x40] sm:$0xff]  ;;  %1810 = vmatpush.bf16.msra.mxu3 %v1807_v35 }
  0x15   : > { %1695 = vmatmul.msk.bf16.vlgmr.msra.gmra.mxu0 %vm386_vm0, %v1779_v18  ;;  %v1788_v44 = vld [vmem:[%s1980_s24 + $0x48] sm:$0xff]  ;;  %v1789_v62 = vld [vmem:[%s1980_s24 + $0x50] sm:$0xff]  ;;  %v2080_v5 = vld [vmem:[%s2535_s2] ss:$0 sm:$0xff] }
  0x16   : > { %1727 = vmatmul.msk.bf16.vlgmr.msra.gmra.mxu2 %vm386_vm0, %v1779_v18  ;;  %1711 = vmatmul.msk.bf16.vlgmr.msra.gmra.mxu1 %vm386_vm0, %v1779_v18 }
  0x17   : > { %1417 = vmatpush.bf16.msrb.mxu0 %v1808_v31 }
  0x18   : > { %1811 = vmatpush.bf16.msra.mxu3 %v1806_v40 }
  0x1b   : > { %1418 = vmatpush.bf16.msrb.mxu0 %v1807_v35 }
  0x1c   : > { %1812 = vmatpush.bf16.msra.mxu3 %v1805_v46 }
  0x1f   : > { %1419 = vmatpush.bf16.msrb.mxu0 %v1806_v40 }
  0x20   : > { %1813 = vmatpush.bf16.msra.mxu3 %v1804_v49 }
  0x23   : > { %1420 = vmatpush.bf16.msrb.mxu0 %v1805_v46 }
  0x24   : > { %1814 = vmatpush.bf16.msra.mxu3 %v1803_v53 }
  0x25   : > { %1696 = vmatmul.msk.bf16.gmra.mxu0 %vm386_vm0, %v1780_v19 }
  0x26   : > { %1728 = vmatmul.msk.bf16.gmra.mxu2 %vm386_vm0, %v1780_v19  ;;  %1712 = vmatmul.msk.bf16.gmra.mxu1 %vm386_vm0, %v1780_v19 }
  0x27   : > { %1421 = vmatpush.bf16.msrb.mxu0 %v1804_v49 }
  0x28   : > { %1815 = vmatpush.bf16.msra.mxu3 %v1802_v58 }
  0x2b   : > { %1422 = vmatpush.bf16.msrb.mxu0 %v1803_v53 }
  0x2c   : > { %1816 = vmatpush.bf16.msra.mxu3 %v1801_v1 }
  0x2f   : > { %1423 = vmatpush.bf16.msrb.mxu0 %v1802_v58 }
  0x33   : > { %1424 = vmatpush.bf16.msrb.mxu0 %v1801_v1 }
  0x35   : > { %1697 = vmatmul.msk.bf16.gmra.mxu0 %vm386_vm0, %v1781_v20 }
  0x36   : > { %1729 = vmatmul.msk.bf16.gmra.mxu2 %vm386_vm0, %v1781_v20  ;;  %1713 = vmatmul.msk.bf16.gmra.mxu1 %vm386_vm0, %v1781_v20 }
  0x45   : > { %1698 = vmatmul.msk.bf16.gmra.mxu0 %vm386_vm0, %v1782_v21 }
  0x46   : > { %1730 = vmatmul.msk.bf16.gmra.mxu2 %vm386_vm0, %v1782_v21  ;;  %1714 = vmatmul.msk.bf16.gmra.mxu1 %vm386_vm0, %v1782_v21 }
  0x55   : > { %1699 = vmatmul.msk.bf16.gmra.mxu0 %vm386_vm0, %v1783_v22 }
  0x56   : > { %1731 = vmatmul.msk.bf16.gmra.mxu2 %vm386_vm0, %v1783_v22  ;;  %1715 = vmatmul.msk.bf16.gmra.mxu1 %vm386_vm0, %v1783_v22 }
  0x65   : > { %1700 = vmatmul.msk.bf16.gmra.mxu0 %vm386_vm0, %v1784_v23 }
  0x66   : > { %1732 = vmatmul.msk.bf16.gmra.mxu2 %vm386_vm0, %v1784_v23  ;;  %1716 = vmatmul.msk.bf16.gmra.mxu1 %vm386_vm0, %v1784_v23 }
  0x75   : > { %1701 = vmatmul.msk.bf16.gmra.mxu0 %vm386_vm0, %v1785_v24 }
  0x76   : > { %1733 = vmatmul.msk.bf16.gmra.mxu2 %vm386_vm0, %v1785_v24  ;;  %1717 = vmatmul.msk.bf16.gmra.mxu1 %vm386_vm0, %v1785_v24 }
  0x85   : > { %1702 = vmatmul.msk.bf16.gmra.mxu0 %vm386_vm0, %v1786_v25 }
  0x86   : > { %1734 = vmatmul.msk.bf16.gmra.mxu2 %vm386_vm0, %v1786_v25  ;;  %1718 = vmatmul.msk.bf16.gmra.mxu1 %vm386_vm0, %v1786_v25 }
  0x92   : > { %v2015_v27 = vpop.f32.mrf.mxu0 }
  0x93   : > { %v2017_v29 = vpop.f32.mrf.mxu1  ;;  %v735_v33 = vrot.slane %v2015_v27, 7 }
  0x95   : > { %1703 = vmatmul.msk.bf16.gmra.mxu0 %vm386_vm0, %v1787_v26 }
  0x96   : > { %1735 = vmatmul.msk.bf16.gmra.mxu2 %vm386_vm0, %v1787_v26  ;;  %1719 = vmatmul.msk.bf16.gmra.mxu1 %vm386_vm0, %v1787_v26  ;;  %v1790_v26 = vld [vmem:[%s1980_s24 + $0x58] sm:$0xff] }
  0x99   : > { %v2027_v32 = vpop.f32.mrf.mxu2 }
  0x9a   : > { %v446_v34 = vpop.f32.mrf.mxu0  ;;  %v848_v42 = vrot.slane %v2027_v32, 1 }
  0x9b   : > { %v736_v36 = vrot.slane %v446_v34, 7  ;;  %v535_v37 = vpop.f32.mrf.mxu1 }
  0x9d   : > { %v798_v38 = vsel %vm767_vm1, %v735_v33, %v736_v36 }
  0x9e   : > { %v946_v39 = vadd.f32 %v798_v38, %v535_v37 }
  0xa1   : > { %v624_v41 = vpop.f32.mrf.mxu2 }
  0xa2   : > { %v849_v43 = vrot.slane %v624_v41, 1  ;;  %v449_v45 = vpop.f32.mrf.mxu0 }
  0xa3   : > { %v538_v48 = vpop.f32.mrf.mxu1  ;;  %v737_v54 = vrot.slane %v449_v45, 7 }
  0xa4   : > { %v2051_v47 = vsel %vm880_vm2, %v848_v42, %v849_v43 }
  0xa5   : > { %1704 = vmatmul.msk.bf16.gmra.mxu0 %vm386_vm0, %v1788_v44  ;;  %v797_v59 = vsel %vm767_vm1, %v736_v36, %v737_v54 }
  0xa6   : > { %1736 = vmatmul.msk.bf16.gmra.mxu2 %vm386_vm0, %v1788_v44  ;;  %1720 = vmatmul.msk.bf16.gmra.mxu1 %vm386_vm0, %v1788_v44  ;;  %v947_v63 = vadd.f32 %v797_v59, %v538_v48 }
  0xa9   : > { %v627_v50 = vpop.f32.mrf.mxu2 }
  0xaa   : > { %v850_v51 = vrot.slane %v627_v50, 1  ;;  %v451_v52 = vpop.f32.mrf.mxu0 }
  0xab   : > { %v540_v56 = vpop.f32.mrf.mxu1  ;;  %v738_v2 = vrot.slane %v451_v52, 7 }
  0xac   : > { %v910_v55 = vsel %vm880_vm2, %v849_v43, %v850_v51 }
  0xad   : > { %v2064_v57 = vadd.f32 %v946_v39, %v910_v55  ;;  %v796_v8 = vsel %vm767_vm1, %v737_v54, %v738_v2 }
  0xae   : > { %v948_v12 = vadd.f32 %v796_v8, %v540_v56 }
  0xb1   : > { %v629_v60 = vpop.f32.mrf.mxu2 }
  0xb2   : > { %v851_v61 = vrot.slane %v629_v60, 1  ;;  %v454_v0 = vpop.f32.mrf.mxu0 }
  0xb3   : > { %v543_v4 = vpop.f32.mrf.mxu1  ;;  %v739_v15 = vrot.slane %v454_v0, 7 }
  0xb4   : > { %v909_v3 = vsel %vm880_vm2, %v850_v51, %v851_v61 }
  0xb5   : > { %v979_v6 = vadd.f32 %v947_v63, %v909_v3  ;;  %1705 = vmatmul.msk.bf16.gmra.mxu0 %vm386_vm0, %v1789_v62  ;;  %v795_v22 = vsel %vm767_vm1, %v738_v2, %v739_v15 }
  0xb6   : > { %1737 = vmatmul.msk.bf16.gmra.mxu2 %vm386_vm0, %v1789_v62  ;;  %1721 = vmatmul.msk.bf16.gmra.mxu1 %vm386_vm0, %v1789_v62  ;;  %v949_v28 = vadd.f32 %v795_v22, %v543_v4  ;;  %v1791_v4 = vld [vmem:[%s1980_s24 + $0x60] sm:$0xff] }
  0xb7   : > { %v1015_v7 = vadd.f32 %v2080_v5, %v979_v6 }
  0xb9   : > { %v632_v9 = vpop.f32.mrf.mxu2  ;;  %v1079_v10 = vmul.f32 %v1015_v7, %v1015_v7  ;;  %v1047_v6 = vmul.f32 0.5, %v1015_v7 }
  0xba   : > { %v852_v11 = vrot.slane %v632_v9, 1  ;;  %v456_v13 = vpop.f32.mrf.mxu0 }
  0xbb   : > { %v1111_v14 = vmul.f32 %v1079_v10, %v1015_v7  ;;  %v545_v17 = vpop.f32.mrf.mxu1  ;;  %v740_v36 = vrot.slane %v456_v13, 7 }
  0xbc   : > { %v908_v16 = vsel %vm880_vm2, %v851_v61, %v852_v11 }
  0xbd   : > { %v980_v18 = vadd.f32 %v948_v12, %v908_v16  ;;  %v1143_v19 = vmul.f32 0.044715, %v1111_v14  ;;  %v794_v44 = vsel %vm767_vm1, %v739_v15, %v740_v36 }
  0xbe   : > { %v950_v50 = vadd.f32 %v794_v44, %v545_v17 }
  0xbf   : > { %v1016_v20 = vadd.f32 %v2080_v5, %v980_v18  ;;  %v1175_v21 = vadd.f32 %v1143_v19, %v1015_v7 }
  0xc1   : > { %v634_v23 = vpop.f32.mrf.mxu2  ;;  %v1080_v24 = vmul.f32 %v1016_v20, %v1016_v20  ;;  %v1207_v35 = vmul.f32 0.7978846, %v1175_v21  ;;  %v1048_v8 = vmul.f32 0.5, %v1016_v20 }
  0xc2   : > { %v853_v25 = vrot.slane %v634_v23, 1  ;;  %v459_v31 = vpop.f32.mrf.mxu0 }
  0xc3   : > { %v1112_v34 = vmul.f32 %v1080_v24, %v1016_v20  ;;  %v548_v38 = vpop.f32.mrf.mxu1  ;;  %1827 = vtanh.f32 %v1207_v35  ;;  %v741_v53 = vrot.slane %v459_v31, 7 }
  0xc4   : > { %v907_v37 = vsel %vm880_vm2, %v852_v11, %v853_v25 }
  0xc5   : > { %v981_v39 = vadd.f32 %v949_v28, %v907_v37  ;;  %v1144_v40 = vmul.f32 0.044715, %v1112_v34  ;;  %1706 = vmatmul.msk.bf16.gmra.mxu0 %vm386_vm0, %v1790_v26  ;;  %v793_v62 = vsel %vm767_vm1, %v740_v36, %v741_v53 }
  0xc6   : > { %1738 = vmatmul.msk.bf16.gmra.mxu2 %vm386_vm0, %v1790_v26  ;;  %1722 = vmatmul.msk.bf16.gmra.mxu1 %vm386_vm0, %v1790_v26  ;;  %v951_v10 = vadd.f32 %v793_v62, %v548_v38 }
  0xc7   : > { %v2099_v41 = vadd.f32 %v2080_v5, %v981_v39  ;;  %v1176_v43 = vadd.f32 %v1144_v40, %v1016_v20 }
  0xc9   : > { %v637_v45 = vpop.f32.mrf.mxu2  ;;  %v1208_v46 = vmul.f32 0.7978846, %v1176_v43  ;;  %v1081_v48 = vmul.f32 %v2099_v41, %v2099_v41  ;;  %v1828_v56 = vpop.eup %1827 }
  0xca   : > { %v854_v49 = vrot.slane %v637_v45, 1  ;;  %v461_v51 = vpop.f32.mrf.mxu0  ;;  %v1271_v63 = vadd.f32 1.0, %v1828_v56 }
  0xcb   : > { %1829 = vtanh.f32 %v1208_v46  ;;  %v1113_v52 = vmul.f32 %v1081_v48, %v2099_v41  ;;  %v550_v55 = vpop.f32.mrf.mxu1  ;;  %v742_v14 = vrot.slane %v461_v51, 7 }
  0xcc   : > { %v906_v54 = vsel %vm880_vm2, %v853_v25, %v854_v49  ;;  %v1303_v17 = vmul.f32 %v1271_v63, %v1047_v6 }
  0xcd   : > { %v982_v58 = vadd.f32 %v950_v50, %v906_v54  ;;  %v1145_v59 = vmul.f32 0.044715, %v1113_v52  ;;  %v792_v23 = vsel %vm767_vm1, %v741_v53, %v742_v14  ;;  %v1792_v53 = vld [vmem:[%s1980_s24 + $0x68] sm:$0xff]  ;;  %v1049_v54 = vmul.f32 0.5, %v2099_v41 }
  0xce   : > { %v952_v31 = vadd.f32 %v792_v23, %v550_v55 }
  0xcf   : > { %v1018_v60 = vadd.f32 %v2080_v5, %v982_v58  ;;  %v1177_v61 = vadd.f32 %v1145_v59, %v2099_v41 }
  0xd1   : > { %v1830_v0 = vpop.eup %1829  ;;  %v639_v1 = vpop.f32.mrf.mxu2  ;;  %v1082_v2 = vmul.f32 %v1018_v60, %v1018_v60  ;;  %v1209_v13 = vmul.f32 0.7978846, %v1177_v61  ;;  %v1050_v55 = vmul.f32 0.5, %v1018_v60 }
  0xd2   : > { %v855_v3 = vrot.slane %v639_v1, 1  ;;  %v1272_v9 = vadd.f32 1.0, %v1830_v0  ;;  %v2114_v11 = vpop.f32.mrf.mxu0 }
  0xd3   : > { %v1114_v12 = vmul.f32 %v1082_v2, %v1018_v60  ;;  %v553_v16 = vpop.f32.mrf.mxu1  ;;  %1831 = vtanh.f32 %v1209_v13  ;;  %v743_v36 = vrot.slane %v2114_v11, 7 }
  0xd4   : > { %v905_v15 = vsel %vm880_vm2, %v854_v49, %v855_v3  ;;  %v1304_v18 = vmul.f32 %v1272_v9, %v1048_v8 }
  0xd5   : > { %v983_v19 = vadd.f32 %v951_v10, %v905_v15  ;;  %v1146_v21 = vmul.f32 0.044715, %v1114_v12  ;;  %1707 = vmatmul.msk.bf16.gmra.mxu0 %vm386_vm0, %v1791_v4  ;;  %v791_v46 = vsel %vm767_vm1, %v742_v14, %v743_v36 }
  0xd6   : > { %1739 = vmatmul.msk.bf16.gmra.mxu2 %vm386_vm0, %v1791_v4  ;;  %v1334_v7 = vpack.c.bf16 %v1304_v18, %v1303_v17  ;;  %1723 = vmatmul.msk.bf16.gmra.mxu1 %vm386_vm0, %v1791_v4  ;;  %v953_v58 = vadd.f32 %v791_v46, %v553_v16 }
  0xd7   : > { %v2121_v20 = vadd.f32 %v2080_v5, %v983_v19  ;;  %v1178_v22 = vadd.f32 %v1146_v21, %v1018_v60 }
  0xd8   : > { %1430 = vmatmul.bf16.vlgmr.msra.gmra.mxu3 %v1334_v7 }
  0xd9   : > { %v642_v24 = vpop.f32.mrf.mxu2  ;;  %v1210_v25 = vmul.f32 0.7978846, %v1178_v22  ;;  %v1083_v26 = vmul.f32 %v2121_v20, %v2121_v20  ;;  %v1832_v39 = vpop.eup %1831 }
  0xda   : > { %v856_v28 = vrot.slane %v642_v24, 1  ;;  %v466_v34 = vpop.f32.mrf.mxu0  ;;  %v1273_v48 = vadd.f32 1.0, %v1832_v39 }
  0xdb   : > { %1833 = vtanh.f32 %v1210_v25  ;;  %v1115_v35 = vmul.f32 %v1083_v26, %v2121_v20  ;;  %v555_v38 = vpop.f32.mrf.mxu1  ;;  %v744_v63 = vrot.slane %v466_v34, 7 }
  0xdc   : > { %v904_v37 = vsel %vm880_vm2, %v855_v3, %v856_v28  ;;  %v1305_v2 = vmul.f32 %v1273_v48, %v1049_v54 }
  0xdd   : > { %v984_v40 = vadd.f32 %v952_v31, %v904_v37  ;;  %v1147_v43 = vmul.f32 0.044715, %v1115_v35  ;;  %v790_v9 = vsel %vm767_vm1, %v743_v36, %v744_v63  ;;  %v1793_v36 = vld [vmem:[%s1980_s24 + $0x70] sm:$0xff]  ;;  %v1051_v37 = vmul.f32 0.5, %v2121_v20 }
  0xde   : > { %v954_v14 = vadd.f32 %v790_v9, %v555_v38 }
  0xdf   : > { %v1020_v44 = vadd.f32 %v2080_v5, %v984_v40  ;;  %v1179_v45 = vadd.f32 %v1147_v43, %v2121_v20 }
  0xe1   : > { %v1834_v49 = vpop.eup %1833  ;;  %v644_v50 = vpop.f32.mrf.mxu2  ;;  %v1084_v51 = vmul.f32 %v1020_v44, %v1020_v44  ;;  %v1211_v62 = vmul.f32 0.7978846, %v1179_v45  ;;  %v1052_v38 = vmul.f32 0.5, %v1020_v44 }
  0xe2   : > { %v857_v52 = vrot.slane %v644_v50, 1  ;;  %v1274_v56 = vadd.f32 1.0, %v1834_v49  ;;  %v2138_v59 = vpop.f32.mrf.mxu0 }
  0xe3   : > { %v1116_v61 = vmul.f32 %v1084_v51, %v1020_v44  ;;  %v558_v1 = vpop.f32.mrf.mxu1  ;;  %1835 = vtanh.f32 %v1211_v62  ;;  %v745_v17 = vrot.slane %v2138_v59, 7 }
  0xe4   : > { %v903_v0 = vsel %vm880_vm2, %v856_v28, %v857_v52  ;;  %v1306_v3 = vmul.f32 %v1274_v56, %v1050_v55 }
  0xe5   : > { %v985_v4 = vadd.f32 %v953_v58, %v903_v0  ;;  %v1148_v6 = vmul.f32 0.044715, %v1116_v61  ;;  %1708 = vmatmul.msk.bf16.gmra.mxu0 %vm386_vm0, %v1792_v53  ;;  %v789_v25 = vsel %vm767_vm1, %v744_v63, %v745_v17 }
  0xe6   : > { %1740 = vmatmul.msk.bf16.gmra.mxu2 %vm386_vm0, %v1792_v53  ;;  %v1335_v41 = vpack.c.bf16 %v1306_v3, %v1305_v2  ;;  %1724 = vmatmul.msk.bf16.gmra.mxu1 %vm386_vm0, %v1792_v53  ;;  %v955_v40 = vadd.f32 %v789_v25, %v558_v1 }
  0xe7   : > { %v2145_v60 = vadd.f32 %v2080_v5, %v985_v4  ;;  %v1180_v8 = vadd.f32 %v1148_v6, %v1020_v44 }
  0xe8   : > { %1435 = vmatmul.bf16.gmra.mxu3 %v1335_v41 }
  0xe9   : > { %v647_v10 = vpop.f32.mrf.mxu2  ;;  %v1212_v11 = vmul.f32 0.7978846, %v1180_v8  ;;  %v1085_v12 = vmul.f32 %v2145_v60, %v2145_v60  ;;  %v1836_v21 = vpop.eup %1835 }
  0xea   : > { %v858_v13 = vrot.slane %v647_v10, 1  ;;  %v471_v15 = vpop.f32.mrf.mxu0  ;;  %v1275_v26 = vadd.f32 1.0, %v1836_v21 }
  0xeb   : > { %1837 = vtanh.f32 %v1212_v11  ;;  %v1117_v16 = vmul.f32 %v1085_v12, %v2145_v60  ;;  %v560_v19 = vpop.f32.mrf.mxu1  ;;  %v746_v48 = vrot.slane %v471_v15, 7 }
  0xec   : > { %v902_v18 = vsel %vm880_vm2, %v857_v52, %v858_v13  ;;  %v1307_v51 = vmul.f32 %v1275_v26, %v1051_v37 }
  0xed   : > { %v986_v7 = vadd.f32 %v954_v14, %v902_v18  ;;  %v1149_v22 = vmul.f32 0.044715, %v1117_v16  ;;  %v788_v56 = vsel %vm767_vm1, %v745_v17, %v746_v48  ;;  %v1794_v17 = vld [vmem:[%s1980_s24 + $0x78] sm:$0xff]  ;;  %v1053_v18 = vmul.f32 0.5, %v2145_v60 }
  0xee   : > { %v956_v63 = vadd.f32 %v788_v56, %v560_v19 }
  0xef   : > { %v1022_v23 = vadd.f32 %v2080_v5, %v986_v7  ;;  %v1181_v24 = vadd.f32 %v1149_v22, %v2145_v60 }
  0xf1   : > { %v1838_v28 = vpop.eup %1837  ;;  %v649_v31 = vpop.f32.mrf.mxu2  ;;  %v1086_v34 = vmul.f32 %v1022_v23, %v1022_v23  ;;  %v1213_v46 = vmul.f32 0.7978846, %v1181_v24  ;;  %v1054_v19 = vmul.f32 0.5, %v1022_v23 }
  0xf2   : > { %v859_v35 = vrot.slane %v649_v31, 1  ;;  %v1276_v39 = vadd.f32 1.0, %v1838_v28  ;;  %v2162_v43 = vpop.f32.mrf.mxu0 }
  0xf3   : > { %v1118_v45 = vmul.f32 %v1086_v34, %v1022_v23  ;;  %v563_v50 = vpop.f32.mrf.mxu1  ;;  %1839 = vtanh.f32 %v1213_v46  ;;  %v747_v2 = vrot.slane %v2162_v43, 7 }
  0xf4   : > { %v901_v49 = vsel %vm880_vm2, %v858_v13, %v859_v35  ;;  %v1308_v52 = vmul.f32 %v1276_v39, %v1052_v38 }
  0xf5   : > { %v987_v53 = vadd.f32 %v955_v40, %v901_v49  ;;  %v1150_v54 = vmul.f32 0.044715, %v1118_v45  ;;  %1709 = vmatmul.msk.bf16.gmra.mxu0 %vm386_vm0, %v1793_v36  ;;  %v787_v11 = vsel %vm767_vm1, %v746_v48, %v747_v2 }
  0xf6   : > { %1741 = vmatmul.msk.bf16.gmra.mxu2 %vm386_vm0, %v1793_v36  ;;  %v1336_v20 = vpack.c.bf16 %v1308_v52, %v1307_v51  ;;  %1725 = vmatmul.msk.bf16.gmra.mxu1 %vm386_vm0, %v1793_v36  ;;  %v957_v7 = vadd.f32 %v787_v11, %v563_v50 }
  0xf7   : > { %v2169_v44 = vadd.f32 %v2080_v5, %v987_v53  ;;  %v1182_v55 = vadd.f32 %v1150_v54, %v1022_v23 }
  0xf8   : > { %1440 = vmatmul.bf16.gmra.mxu3 %v1336_v20 }
  0xf9   : > { %v652_v58 = vpop.f32.mrf.mxu2  ;;  %v1214_v59 = vmul.f32 0.7978846, %v1182_v55  ;;  %v1087_v61 = vmul.f32 %v2169_v44, %v2169_v44  ;;  %v1840_v6 = vpop.eup %1839 }
  0xfa   : > { %v860_v62 = vrot.slane %v652_v58, 1  ;;  %v476_v0 = vpop.f32.mrf.mxu0  ;;  %v1277_v12 = vadd.f32 1.0, %v1840_v6 }
  0xfb   : > { %1841 = vtanh.f32 %v1214_v59  ;;  %v1119_v1 = vmul.f32 %v1087_v61, %v2169_v44  ;;  %v565_v4 = vpop.f32.mrf.mxu1  ;;  %v748_v26 = vrot.slane %v476_v0, 7  ;;  %v1055_v0 = vmul.f32 0.5, %v2169_v44 }
  0xfc   : > { %v900_v3 = vsel %vm880_vm2, %v859_v35, %v860_v62  ;;  %v1309_v34 = vmul.f32 %v1277_v12, %v1053_v18 }
  0xfd   : > { %v988_v41 = vadd.f32 %v956_v63, %v900_v3  ;;  %v1151_v8 = vmul.f32 0.044715, %v1119_v1  ;;  %v786_v39 = vsel %vm767_vm1, %v747_v2, %v748_v26 }
  0xfe   : > { %v958_v48 = vadd.f32 %v786_v39, %v565_v4 }
  0xff   : > { %v1024_v9 = vadd.f32 %v2080_v5, %v988_v41  ;;  %v1183_v10 = vadd.f32 %v1151_v8, %v2169_v44  ;;  %v2212_v44 = vadd.s32 120, %v2022_v30 }
 0x101   : > { %v1842_v13 = vpop.eup %1841  ;;  %v654_v14 = vpop.f32.mrf.mxu2  ;;  %v1088_v15 = vmul.f32 %v1024_v9, %v1024_v9  ;;  %v1215_v25 = vmul.f32 0.7978846, %v1183_v10  ;;  %v1056_v3 = vmul.f32 0.5, %v1024_v9  ;;  %vm847_vm3 = vcmp.eq.s32.totalorder %v2212_v44, 127 }
 0x102   : > { %v861_v16 = vrot.slane %v654_v14, 1  ;;  %v1278_v21 = vadd.f32 1.0, %v1842_v13  ;;  %v2186_v22 = vpop.f32.mrf.mxu0 }
 0x103   : > { %v1120_v24 = vmul.f32 %v1088_v15, %v1024_v9  ;;  %v568_v31 = vpop.f32.mrf.mxu1  ;;  %1843 = vtanh.f32 %v1215_v25  ;;  %v749_v51 = vrot.slane %v2186_v22, 7 }
 0x104   : > { %v899_v28 = vsel %vm880_vm2, %v860_v62, %v861_v16  ;;  %v1310_v35 = vmul.f32 %v1278_v21, %v1054_v19 }
 0x105   : > { %v989_v36 = vadd.f32 %v957_v7, %v899_v28  ;;  %v1152_v37 = vmul.f32 0.044715, %v1120_v24  ;;  %1710 = vmatmul.msk.bf16.gmra.mxu0 %vm386_vm0, %v1794_v17  ;;  %v785_v59 = vsel %vm767_vm1, %v748_v26, %v749_v51 }
 0x106   : > { %1742 = vmatmul.msk.bf16.gmra.mxu2 %vm386_vm0, %v1794_v17  ;;  %v1337_v60 = vpack.c.bf16 %v1310_v35, %v1309_v34  ;;  %1726 = vmatmul.msk.bf16.gmra.mxu1 %vm386_vm0, %v1794_v17  ;;  %v959_v41 = vadd.f32 %v785_v59, %v568_v31 }
 0x107   : > { %v2193_v23 = vadd.f32 %v2080_v5, %v989_v36  ;;  %v1184_v38 = vadd.f32 %v1152_v37, %v1024_v9 }
 0x108   : > { %1445 = vmatmul.bf16.gmra.mxu3 %v1337_v60 }
 0x109   : > { %v657_v40 = vpop.f32.mrf.mxu2  ;;  %v1216_v43 = vmul.f32 0.7978846, %v1184_v38  ;;  %v1089_v45 = vmul.f32 %v2193_v23, %v2193_v23  ;;  %v1844_v54 = vpop.eup %1843 }
 0x10a   : > { %v862_v46 = vrot.slane %v657_v40, 1  ;;  %v481_v49 = vpop.f32.mrf.mxu0  ;;  %v1279_v61 = vadd.f32 1.0, %v1844_v54 }
 0x10b   : > { %1845 = vtanh.f32 %v1216_v43  ;;  %v1121_v50 = vmul.f32 %v1089_v45, %v2193_v23  ;;  %v570_v53 = vpop.f32.mrf.mxu1  ;;  %v750_v15 = vrot.slane %v481_v49, 7 }
 0x10c   : > { %v898_v52 = vsel %vm880_vm2, %v861_v16, %v862_v46  ;;  %v1311_v13 = vmul.f32 %v1279_v61, %v1055_v0 }
 0x10d   : > { %v990_v20 = vadd.f32 %v958_v48, %v898_v52  ;;  %v1153_v55 = vmul.f32 0.044715, %v1121_v50  ;;  %v784_v21 = vsel %vm767_vm1, %v749_v51, %v750_v15  ;;  %v1057_v51 = vmul.f32 0.5, %v2193_v23 }
 0x10e   : > { %v960_v35 = vadd.f32 %v784_v21, %v570_v53 }
 0x10f   : > { %v1026_v56 = vadd.f32 %v2080_v5, %v990_v20  ;;  %v1185_v58 = vadd.f32 %v1153_v55, %v2193_v23 }
 0x111   : > { %v1846_v62 = vpop.eup %1845  ;;  %v659_v63 = vpop.f32.mrf.mxu2  ;;  %v1090_v1 = vmul.f32 %v1026_v56, %v1026_v56  ;;  %v1217_v6 = vmul.f32 0.7978846, %v1185_v58  ;;  %v1058_v53 = vmul.f32 0.5, %v1026_v56 }
 0x112   : > { %v863_v2 = vrot.slane %v659_v63, 1  ;;  %v1280_v4 = vadd.f32 1.0, %v1846_v62  ;;  %v484_v8 = vpop.f32.mrf.mxu0 }
 0x113   : > { %v1122_v10 = vmul.f32 %v1090_v1, %v1026_v56  ;;  %v573_v12 = vpop.f32.mrf.mxu1  ;;  %1847 = vtanh.f32 %v1217_v6  ;;  %v751_v7 = vrot.slane %v484_v8, 7 }
 0x114   : > { %v897_v11 = vsel %vm880_vm2, %v862_v46, %v863_v2  ;;  %v1312_v14 = vmul.f32 %v1280_v4, %v1056_v3 }
 0x115   : > { %v991_v16 = vadd.f32 %v959_v41, %v897_v11  ;;  %v1154_v17 = vmul.f32 0.044715, %v1122_v10  ;;  %v783_v60 = vsel %vm767_vm1, %v750_v15, %v751_v7 }
 0x116   : > { %v1338_v18 = vpack.c.bf16 %v1312_v14, %v1311_v13  ;;  %v816_v45 = vsel %vm719_vm4, %v484_v8, %v783_v60 }
 0x117   : > { %v2215_v9 = vadd.f32 %v2080_v5, %v991_v16  ;;  %v1186_v19 = vadd.f32 %v1154_v17, %v1026_v56  ;;  %v961_v55 = vadd.f32 %v816_v45, %v573_v12 }
 0x118   : > { %1450 = vmatmul.bf16.gmra.mxu3 %v1338_v18 }
 0x119   : > { %v662_v22 = vpop.f32.mrf.mxu2  ;;  %v1218_v24 = vmul.f32 0.7978846, %v1186_v19  ;;  %v1091_v25 = vmul.f32 %v2215_v9, %v2215_v9  ;;  %v1848_v34 = vpop.eup %1847 }
 0x11a   : > { %v864_v26 = vrot.slane %v662_v22, 1  ;;  %v486_v28 = vpop.f32.mrf.mxu0  ;;  %v1281_v43 = vadd.f32 1.0, %v1848_v34 }
 0x11b   : > { %1849 = vtanh.f32 %v1218_v24  ;;  %v1123_v31 = vmul.f32 %v1091_v25, %v2215_v9  ;;  %v575_v37 = vpop.f32.mrf.mxu1  ;;  %v752_v58 = vrot.slane %v486_v28, 7 }
 0x11c   : > { %v896_v36 = vsel %vm880_vm2, %v863_v2, %v864_v26  ;;  %v1313_v61 = vmul.f32 %v1281_v43, %v1057_v51 }
 0x11d   : > { %v928_v38 = vsel %vm847_vm3, %v659_v63, %v896_v36  ;;  %v1155_v39 = vmul.f32 0.044715, %v1123_v31  ;;  %v782_v56 = vsel %vm767_vm1, %v751_v7, %v752_v58  ;;  %v1059_v36 = vmul.f32 0.5, %v2215_v9 }
 0x11e   : > { %v992_v40 = vadd.f32 %v960_v35, %v928_v38  ;;  %v962_v13 = vadd.f32 %v782_v56, %v575_v37 }
 0x11f   : > { %v1187_v48 = vadd.f32 %v1155_v39, %v2215_v9 }
 0x120   : > { %v1028_v46 = vadd.f32 %v2080_v5, %v992_v40 }
 0x121   : > { %v1850_v49 = vpop.eup %1849  ;;  %v664_v50 = vpop.f32.mrf.mxu2  ;;  %v1219_v2 = vmul.f32 0.7978846, %v1187_v48 }
 0x122   : > { %v865_v52 = vrot.slane %v664_v50, 1  ;;  %v1282_v54 = vadd.f32 1.0, %v1850_v49  ;;  %v1092_v20 = vmul.f32 %v1028_v46, %v1028_v46  ;;  %v489_v59 = vpop.f32.mrf.mxu0  ;;  %v1060_v37 = vmul.f32 0.5, %v1028_v46 }
 0x123   : > { %v578_v63 = vpop.f32.mrf.mxu1  ;;  %1851 = vtanh.f32 %v1219_v2  ;;  %v753_v16 = vrot.slane %v489_v59, 7 }
 0x124   : > { %v895_v62 = vsel %vm880_vm2, %v864_v26, %v865_v52  ;;  %v1314_v0 = vmul.f32 %v1282_v54, %v1058_v53  ;;  %v1124_v1 = vmul.f32 %v1092_v20, %v1028_v46 }
 0x125   : > { %v993_v3 = vadd.f32 %v961_v55, %v895_v62  ;;  %v781_v25 = vsel %vm767_vm1, %v752_v58, %v753_v16 }
 0x126   : > { %v1339_v4 = vpack.c.bf16 %v1314_v0, %v1313_v61  ;;  %v1156_v6 = vmul.f32 0.044715, %v1124_v1  ;;  %v963_v60 = vadd.f32 %v781_v25, %v578_v63 }
 0x127   : > { %v2238_v23 = vadd.f32 %v2080_v5, %v993_v3 }
 0x128   : > { %1455 = vmatmul.bf16.gmra.mxu3 %v1339_v4  ;;  %v1188_v41 = vadd.f32 %v1156_v6, %v1028_v46 }
 0x129   : > { %v667_v8 = vpop.f32.mrf.mxu2  ;;  %v1093_v10 = vmul.f32 %v2238_v23, %v2238_v23  ;;  %v1852_v7 = vpop.eup %1851 }
 0x12a   : > { %v866_v11 = vrot.slane %v667_v8, 1  ;;  %v1220_v12 = vmul.f32 0.7978846, %v1188_v41  ;;  %v491_v14 = vpop.f32.mrf.mxu0  ;;  %v1283_v28 = vadd.f32 1.0, %v1852_v7 }
 0x12b   : > { %v1125_v15 = vmul.f32 %v1093_v10, %v2238_v23  ;;  %v580_v18 = vpop.f32.mrf.mxu1  ;;  %v754_v45 = vrot.slane %v491_v14, 7 }
 0x12c   : > { %v894_v17 = vsel %vm880_vm2, %v865_v52, %v866_v11  ;;  %1853 = vtanh.f32 %v1220_v12  ;;  %v1315_v51 = vmul.f32 %v1283_v28, %v1059_v36 }
 0x12d   : > { %v994_v19 = vadd.f32 %v962_v13, %v894_v17  ;;  %v1157_v21 = vmul.f32 0.044715, %v1125_v15  ;;  %v780_v46 = vsel %vm767_vm1, %v753_v16, %v754_v45  ;;  %v1061_v16 = vmul.f32 0.5, %v2238_v23 }
 0x12e   : > { %v964_v62 = vadd.f32 %v780_v46, %v580_v18 }
 0x12f   : > { %v1030_v22 = vadd.f32 %v2080_v5, %v994_v19  ;;  %v1189_v24 = vadd.f32 %v1157_v21, %v2238_v23 }
 0x131   : > { %v669_v26 = vpop.f32.mrf.mxu2  ;;  %v1094_v31 = vmul.f32 %v1030_v22, %v1030_v22  ;;  %v1221_v43 = vmul.f32 0.7978846, %v1189_v24  ;;  %v1062_v17 = vmul.f32 0.5, %v1030_v22 }
 0x132   : > { %v1854_v34 = vpop.eup %1853  ;;  %v867_v35 = vrot.slane %v669_v26, 1  ;;  %v494_v38 = vpop.f32.mrf.mxu0 }
 0x133   : > { %v1284_v39 = vadd.f32 1.0, %v1854_v34  ;;  %v1126_v40 = vmul.f32 %v1094_v31, %v1030_v22  ;;  %v583_v49 = vpop.f32.mrf.mxu1  ;;  %1855 = vtanh.f32 %v1221_v43  ;;  %v755_v1 = vrot.slane %v494_v38, 7 }
 0x134   : > { %v893_v48 = vsel %vm880_vm2, %v866_v11, %v867_v35 }
 0x135   : > { %v995_v50 = vadd.f32 %v963_v60, %v893_v48  ;;  %v1316_v52 = vmul.f32 %v1284_v39, %v1060_v37  ;;  %v1158_v53 = vmul.f32 0.044715, %v1126_v40  ;;  %v779_v10 = vsel %vm767_vm1, %v754_v45, %v755_v1 }
 0x136   : > { %v965_v19 = vadd.f32 %v779_v10, %v583_v49 }
 0x137   : > { %v2255_v54 = vadd.f32 %v2080_v5, %v995_v50  ;;  %v1340_v20 = vpack.c.bf16 %v1316_v52, %v1315_v51  ;;  %v1190_v9 = vadd.f32 %v1158_v53, %v1030_v22 }
 0x139   : > { %v672_v55 = vpop.f32.mrf.mxu2  ;;  %1460 = vmatmul.bf16.gmra.mxu3 %v1340_v20  ;;  %v1222_v58 = vmul.f32 0.7978846, %v1190_v9  ;;  %v1095_v59 = vmul.f32 %v2255_v54, %v2255_v54  ;;  %v1856_v4 = vpop.eup %1855 }
 0x13a   : > { %v868_v61 = vrot.slane %v672_v55, 1  ;;  %v496_v63 = vpop.f32.mrf.mxu0  ;;  %v1285_v11 = vadd.f32 1.0, %v1856_v4 }
 0x13b   : > { %1857 = vtanh.f32 %v1222_v58  ;;  %v1127_v0 = vmul.f32 %v1095_v59, %v2255_v54  ;;  %v585_v3 = vpop.f32.mrf.mxu1  ;;  %v756_v25 = vrot.slane %v496_v63, 7 }
 0x13c   : > { %v892_v2 = vsel %vm880_vm2, %v867_v35, %v868_v61  ;;  %v1317_v31 = vmul.f32 %v1285_v11, %v1061_v16 }
 0x13d   : > { %v996_v6 = vadd.f32 %v964_v62, %v892_v2  ;;  %v1159_v56 = vmul.f32 0.044715, %v1127_v0  ;;  %v778_v22 = vsel %vm767_vm1, %v755_v1, %v756_v25  ;;  %v1063_v1 = vmul.f32 0.5, %v2255_v54 }
 0x13e   : > { %v966_v45 = vadd.f32 %v778_v22, %v585_v3 }
 0x13f   : > { %v1032_v41 = vadd.f32 %v2080_v5, %v996_v6  ;;  %v1191_v8 = vadd.f32 %v1159_v56, %v2255_v54 }
 0x141   : > { %v1858_v12 = vpop.eup %1857  ;;  %v674_v13 = vpop.f32.mrf.mxu2  ;;  %v1096_v14 = vmul.f32 %v1032_v41, %v1032_v41  ;;  %v1223_v24 = vmul.f32 0.7978846, %v1191_v8  ;;  %v1064_v2 = vmul.f32 0.5, %v1032_v41 }
 0x142   : > { %v869_v15 = vrot.slane %v674_v13, 1  ;;  %v1286_v18 = vadd.f32 1.0, %v1858_v12  ;;  %v499_v21 = vpop.f32.mrf.mxu0 }
 0x143   : > { %v1128_v7 = vmul.f32 %v1096_v14, %v1032_v41  ;;  %v588_v28 = vpop.f32.mrf.mxu1  ;;  %1859 = vtanh.f32 %v1223_v24  ;;  %v757_v50 = vrot.slane %v499_v21, 7 }
 0x144   : > { %v891_v26 = vsel %vm880_vm2, %v868_v61, %v869_v15  ;;  %v1318_v34 = vmul.f32 %v1286_v18, %v1062_v17 }
 0x145   : > { %v997_v35 = vadd.f32 %v965_v19, %v891_v26  ;;  %v1160_v36 = vmul.f32 0.044715, %v1128_v7  ;;  %v777_v58 = vsel %vm767_vm1, %v756_v25, %v757_v50  ;;  %v2299_v19 = vld [vmem:[%s2537_s4] ss:$0 sm:$0xff] }
 0x146   : > { %v1341_v37 = vpack.c.bf16 %v1318_v34, %v1317_v31  ;;  %v967_v4 = vadd.f32 %v777_v58, %v588_v28 }
 0x147   : > { %v2272_v60 = vadd.f32 %v2080_v5, %v997_v35  ;;  %v1192_v23 = vadd.f32 %v1160_v36, %v1032_v41 }
 0x149   : > { %v677_v38 = vpop.f32.mrf.mxu2  ;;  %1465 = vmatmul.bf16.gmra.mxu3 %v1341_v37  ;;  %v1224_v39 = vmul.f32 0.7978846, %v1192_v23  ;;  %v1097_v40 = vmul.f32 %v2272_v60, %v2272_v60  ;;  %v1860_v53 = vpop.eup %1859 }
 0x14a   : > { %v870_v43 = vrot.slane %v677_v38, 1  ;;  %v501_v48 = vpop.f32.mrf.mxu0  ;;  %v1287_v59 = vadd.f32 1.0, %v1860_v53  ;;  %v1065_v53 = vmul.f32 0.5, %v2272_v60 }
 0x14b   : > { %1861 = vtanh.f32 %v1224_v39  ;;  %v1129_v49 = vmul.f32 %v1097_v40, %v2272_v60  ;;  %v590_v52 = vpop.f32.mrf.mxu1  ;;  %v758_v10 = vrot.slane %v501_v48, 7 }
 0x14c   : > { %v890_v51 = vsel %vm880_vm2, %v869_v15, %v870_v43  ;;  %v1319_v13 = vmul.f32 %v1287_v59, %v1063_v1 }
 0x14d   : > { %v998_v20 = vadd.f32 %v966_v45, %v890_v51  ;;  %v1161_v9 = vmul.f32 0.044715, %v1129_v49  ;;  %v776_v18 = vsel %vm767_vm1, %v757_v50, %v758_v10 }
 0x14e   : > { %v968_v26 = vadd.f32 %v776_v18, %v590_v52 }
 0x14f   : > { %v1034_v46 = vadd.f32 %v2080_v5, %v998_v20  ;;  %v1193_v55 = vadd.f32 %v1161_v9, %v2272_v60 }
 0x151   : > { %v1862_v61 = vpop.eup %1861  ;;  %v679_v62 = vpop.f32.mrf.mxu2  ;;  %v1098_v63 = vmul.f32 %v1034_v46, %v1034_v46  ;;  %v1225_v8 = vmul.f32 0.7978846, %v1193_v55  ;;  %v1066_v20 = vmul.f32 0.5, %v1034_v46 }
 0x152   : > { %v871_v0 = vrot.slane %v679_v62, 1  ;;  %v1288_v3 = vadd.f32 1.0, %v1862_v61  ;;  %v2286_v6 = vpop.f32.mrf.mxu0 }
 0x153   : > { %v1130_v56 = vmul.f32 %v1098_v63, %v1034_v46  ;;  %v593_v12 = vpop.f32.mrf.mxu1  ;;  %1863 = vtanh.f32 %v1225_v8  ;;  %v759_v35 = vrot.slane %v2286_v6, 7 }
 0x154   : > { %v889_v11 = vsel %vm880_vm2, %v870_v43, %v871_v0  ;;  %v1320_v14 = vmul.f32 %v1288_v3, %v1064_v2 }
 0x155   : > { %v999_v15 = vadd.f32 %v967_v4, %v889_v11  ;;  %v1162_v16 = vmul.f32 0.044715, %v1130_v56  ;;  %v775_v45 = vsel %vm767_vm1, %v758_v10, %v759_v35 }
 0x156   : > { %v1342_v17 = vpack.c.bf16 %v1320_v14, %v1319_v13  ;;  %v969_v55 = vadd.f32 %v775_v45, %v593_v12 }
 0x157   : > { %v2291_v54 = vadd.f32 %v2080_v5, %v999_v15  ;;  %v1194_v41 = vadd.f32 %v1162_v16, %v1034_v46 }
 0x159   : > { %v682_v21 = vpop.f32.mrf.mxu2  ;;  %1470 = vmatmul.bf16.gmra.mxu3 %v1342_v17  ;;  %v1226_v7 = vmul.f32 0.7978846, %v1194_v41  ;;  %v1099_v24 = vmul.f32 %v2291_v54, %v2291_v54  ;;  %v1864_v22 = vpop.eup %1863 }
 0x15a   : > { %v872_v25 = vrot.slane %v682_v21, 1  ;;  %v2303_v28 = vpop.f32.mrf.mxu0  ;;  %v1289_v48 = vadd.f32 1.0, %v1864_v22 }
 0x15b   : > { %v1431_v31 = vpop.f32.mrf.mxu3  ;;  %1865 = vtanh.f32 %v1226_v7  ;;  %v1131_v34 = vmul.f32 %v1099_v24, %v2291_v54  ;;  %v595_v23 = vpop.f32.mrf.mxu1  ;;  %v760_v58 = vrot.slane %v2303_v28, 7 }
 0x15c   : > { %v888_v36 = vsel %vm880_vm2, %v871_v0, %v872_v25  ;;  %v1432_v37 = vadd.f32 %v2299_v19, %v1431_v31  ;;  %v1321_v3 = vmul.f32 %v1289_v48, %v1065_v53 }
 0x15d   : > { %v1000_v38 = vadd.f32 %v968_v26, %v888_v36  ;;  %v1163_v39 = vmul.f32 0.044715, %v1131_v34  ;;  %v774_v10 = vsel %vm767_vm1, %v759_v35, %v760_v58 }
 0x15e   : > { %1508 = vst.msk [vmem:[%s2308_s25 + $0x10] sm:$0xff] %vm386_vm0, %v1432_v37  ;;  %v970_v15 = vadd.f32 %v774_v10, %v595_v23 }
 0x15f   : > { %v1036_v40 = vadd.f32 %v2080_v5, %v1000_v38  ;;  %v1195_v43 = vadd.f32 %v1163_v39, %v2291_v54  ;;  %v1067_v39 = vmul.f32 0.5, %v2291_v54 }
 0x161   : > { %v1866_v49 = vpop.eup %1865  ;;  %v684_v50 = vpop.f32.mrf.mxu2  ;;  %v1100_v51 = vmul.f32 %v1036_v40, %v1036_v40  ;;  %v1227_v63 = vmul.f32 0.7978846, %v1195_v43  ;;  %v1068_v43 = vmul.f32 0.5, %v1036_v40 }
 0x162   : > { %v873_v52 = vrot.slane %v684_v50, 1  ;;  %v1290_v9 = vadd.f32 1.0, %v1866_v49  ;;  %v2323_v59 = vpop.f32.mrf.mxu0 }
 0x163   : > { %v1433_v61 = vpop.f32.mrf.mxu3  ;;  %v1132_v62 = vmul.f32 %v1100_v51, %v1036_v40  ;;  %v598_v2 = vpop.f32.mrf.mxu1  ;;  %1867 = vtanh.f32 %v1227_v63  ;;  %v761_v18 = vrot.slane %v2323_v59, 7 }
 0x164   : > { %v887_v0 = vsel %vm880_vm2, %v872_v25, %v873_v52  ;;  %v1434_v1 = vadd.f32 %v2299_v19, %v1433_v61  ;;  %v1322_v4 = vmul.f32 %v1290_v9, %v1066_v20  ;;  %v2362_v61 = vld [vmem:[%s2535_s2] ss:$0 sm:$0xff] }
 0x165   : > { %v1001_v60 = vadd.f32 %v969_v55, %v887_v0  ;;  %v1164_v6 = vmul.f32 0.044715, %v1132_v62  ;;  %v773_v35 = vsel %vm767_vm1, %v760_v58, %v761_v18 }
 0x166   : > { %1509 = vst.msk [vmem:[%s2308_s25 + $0x18] sm:$0xff] %vm386_vm0, %v1434_v1  ;;  %v1343_v46 = vpack.c.bf16 %v1322_v4, %v1321_v3  ;;  %v971_v48 = vadd.f32 %v773_v35, %v598_v2 }
 0x167   : > { %v2331_v56 = vadd.f32 %v2080_v5, %v1001_v60  ;;  %v1196_v8 = vadd.f32 %v1164_v6, %v1036_v40 }
 0x169   : > { %v687_v11 = vpop.f32.mrf.mxu2  ;;  %1475 = vmatmul.bf16.gmra.mxu3 %v1343_v46  ;;  %v1228_v12 = vmul.f32 0.7978846, %v1196_v8  ;;  %v1101_v13 = vmul.f32 %v2331_v56, %v2331_v56  ;;  %v1868_v25 = vpop.eup %1867  ;;  %v1069_v35 = vmul.f32 0.5, %v2331_v56 }
 0x16a   : > { %v874_v14 = vrot.slane %v687_v11, 1  ;;  %v2337_v16 = vpop.f32.mrf.mxu0  ;;  %v1291_v36 = vadd.f32 1.0, %v1868_v25 }
 0x16b   : > { %v1436_v17 = vpop.f32.mrf.mxu3  ;;  %1869 = vtanh.f32 %v1228_v12  ;;  %v1133_v41 = vmul.f32 %v1101_v13, %v2331_v56  ;;  %v600_v24 = vpop.f32.mrf.mxu1  ;;  %v762_v49 = vrot.slane %v2337_v16, 7 }
 0x16c   : > { %v886_v21 = vsel %vm880_vm2, %v873_v52, %v874_v14  ;;  %v1437_v7 = vadd.f32 %v2299_v19, %v1436_v17  ;;  %v1323_v55 = vmul.f32 %v1291_v36, %v1067_v39 }
 0x16d   : > { %v1002_v26 = vadd.f32 %v970_v15, %v886_v21  ;;  %v1165_v28 = vmul.f32 0.044715, %v1133_v41  ;;  %v772_v0 = vsel %vm767_vm1, %v761_v18, %v762_v49 }
 0x16e   : > { %1510 = vst.msk [vmem:[%s2308_s25 + $0x20] sm:$0xff] %vm386_vm0, %v1437_v7  ;;  %v972_v60 = vadd.f32 %v772_v0, %v600_v24  ;;  %v2388_v24 = vadd.f32 %v2362_v61, %v2064_v57 }
 0x16f   : > { %v1038_v31 = vadd.f32 %v2080_v5, %v1002_v26  ;;  %v1197_v34 = vadd.f32 %v1165_v28, %v2331_v56 }
 0x170   : > { %v1078_v56 = vmul.f32 %v2388_v24, %v2388_v24 }
 0x171   : > { %v1870_v37 = vpop.eup %1869  ;;  %v689_v23 = vpop.f32.mrf.mxu2  ;;  %v1102_v22 = vmul.f32 %v1038_v31, %v1038_v31  ;;  %v1229_v52 = vmul.f32 0.7978846, %v1197_v34  ;;  %v1070_v36 = vmul.f32 0.5, %v1038_v31 }
 0x172   : > { %v875_v38 = vrot.slane %v689_v23, 1  ;;  %v1292_v45 = vadd.f32 1.0, %v1870_v37  ;;  %v2352_v50 = vpop.f32.mrf.mxu0 }
 0x173   : > { %v1438_v5 = vpop.f32.mrf.mxu3  ;;  %v1134_v51 = vmul.f32 %v1102_v22, %v1038_v31  ;;  %v603_v9 = vpop.f32.mrf.mxu1  ;;  %1871 = vtanh.f32 %v1229_v52  ;;  %v763_v10 = vrot.slane %v2352_v50, 7 }
 0x174   : > { %v885_v53 = vsel %vm880_vm2, %v874_v14, %v875_v38  ;;  %v1439_v20 = vadd.f32 %v2299_v19, %v1438_v5  ;;  %v1324_v58 = vmul.f32 %v1292_v45, %v1068_v43 }
 0x175   : > { %v1003_v54 = vadd.f32 %v971_v48, %v885_v53  ;;  %v1166_v59 = vmul.f32 0.044715, %v1134_v51  ;;  %v771_v18 = vsel %vm767_vm1, %v762_v49, %v763_v10 }
 0x176   : > { %1511 = vst.msk [vmem:[%s2308_s25 + $0x28] sm:$0xff] %vm386_vm0, %v1439_v20  ;;  %v1344_v40 = vpack.c.bf16 %v1324_v58, %v1323_v55  ;;  %v973_v23 = vadd.f32 %v771_v18, %v603_v9  ;;  %v1110_v9 = vmul.f32 %v1078_v56, %v2388_v24 }
 0x177   : > { %v2365_v62 = vadd.f32 %v2362_v61, %v1003_v54  ;;  %v1198_v63 = vadd.f32 %v1166_v59, %v1038_v31 }
 0x179   : > { %v692_v1 = vpop.f32.mrf.mxu2  ;;  %1480 = vmatmul.bf16.gmra.mxu3 %v1344_v40  ;;  %v1230_v2 = vmul.f32 0.7978846, %v1198_v63  ;;  %v1103_v3 = vmul.f32 %v2365_v62, %v2365_v62  ;;  %v1872_v13 = vpop.eup %1871 }
 0x17a   : > { %v876_v4 = vrot.slane %v692_v1, 1  ;;  %v2371_v6 = vpop.f32.mrf.mxu0  ;;  %v1293_v21 = vadd.f32 1.0, %v1872_v13 }
 0x17b   : > { %v1441_v46 = vpop.f32.mrf.mxu3  ;;  %1873 = vtanh.f32 %v1230_v2  ;;  %v1135_v8 = vmul.f32 %v1103_v3, %v2365_v62  ;;  %v605_v15 = vpop.f32.mrf.mxu1  ;;  %v764_v22 = vrot.slane %v2371_v6, 7 }
 0x17c   : > { %v884_v11 = vsel %vm880_vm2, %v875_v38, %v876_v4  ;;  %v1442_v12 = vadd.f32 %v2299_v19, %v1441_v46  ;;  %v1325_v48 = vmul.f32 %v1293_v21, %v1069_v35 }
 0x17d   : > { %v1004_v14 = vadd.f32 %v972_v60, %v884_v11  ;;  %v1167_v16 = vmul.f32 0.044715, %v1135_v8  ;;  %v770_v20 = vsel %vm767_vm1, %v763_v10, %v764_v22  ;;  %v1142_v10 = vmul.f32 0.044715, %v1110_v9 }
 0x17e   : > { %1512 = vst.msk [vmem:[%s2308_s25 + $0x30] sm:$0xff] %vm386_vm0, %v1442_v12  ;;  %v974_v63 = vadd.f32 %v770_v20, %v605_v15 }
 0x17f   : > { %v2381_v17 = vadd.f32 %v2362_v61, %v1004_v14  ;;  %v1199_v41 = vadd.f32 %v1167_v16, %v2365_v62 }
 0x181   : > { %v1874_v7 = vpop.eup %1873  ;;  %v694_v25 = vpop.f32.mrf.mxu2  ;;  %v1104_v26 = vmul.f32 %v2381_v17, %v2381_v17  ;;  %v1231_v28 = vmul.f32 0.7978846, %v1199_v41 }
 0x182   : > { %v877_v34 = vrot.slane %v694_v25, 1  ;;  %v1294_v37 = vadd.f32 1.0, %v1874_v7  ;;  %v519_v38 = vpop.f32.mrf.mxu0  ;;  %v1071_v25 = vmul.f32 0.5, %v2365_v62 }
 0x183   : > { %v1443_v39 = vpop.f32.mrf.mxu3  ;;  %v1136_v43 = vmul.f32 %v1104_v26, %v2381_v17  ;;  %1875 = vtanh.f32 %v1231_v28  ;;  %v608_v52 = vpop.f32.mrf.mxu1  ;;  %v765_v3 = vrot.slane %v519_v38, 7  ;;  %v1072_v26 = vmul.f32 0.5, %v2381_v17 }
 0x184   : > { %v883_v57 = vsel %vm880_vm2, %v876_v4, %v877_v34  ;;  %v1444_v45 = vadd.f32 %v2299_v19, %v1443_v39  ;;  %v1326_v49 = vmul.f32 %v1294_v37, %v1070_v36  ;;  %v1174_v28 = vadd.f32 %v1142_v10, %v2388_v24 }
 0x185   : > { %v1005_v50 = vadd.f32 %v973_v23, %v883_v57  ;;  %v1168_v31 = vmul.f32 0.044715, %v1136_v43  ;;  %v769_v18 = vsel %vm767_vm1, %v764_v22, %v765_v3 }
 0x186   : > { %1513 = vst.msk [vmem:[%s2308_s25 + $0x38] sm:$0xff] %vm386_vm0, %v1444_v45  ;;  %v1345_v5 = vpack.c.bf16 %v1326_v49, %v1325_v48  ;;  %v975_v23 = vadd.f32 %v769_v18, %v608_v52  ;;  %v1206_v52 = vmul.f32 0.7978846, %v1174_v28 }
 0x187   : > { %v2403_v51 = vadd.f32 %v2362_v61, %v1005_v50  ;;  %v1200_v53 = vadd.f32 %v1168_v31, %v2381_v17 }
 0x189   : > { %v697_v55 = vpop.f32.mrf.mxu2  ;;  %1485 = vmatmul.bf16.gmra.mxu3 %v1345_v5  ;;  %v1232_v58 = vmul.f32 0.7978846, %v1200_v53  ;;  %v1105_v54 = vmul.f32 %v2403_v51, %v2403_v51  ;;  %v1876_v40 = vpop.eup %1875 }
 0x18a   : > { %v878_v59 = vrot.slane %v697_v55, 1  ;;  %v521_v0 = vpop.f32.mrf.mxu0  ;;  %v1295_v12 = vadd.f32 1.0, %v1876_v40 }
 0x18b   : > { %v1446_v1 = vpop.f32.mrf.mxu3  ;;  %1877 = vtanh.f32 %v1232_v58  ;;  %v1137_v2 = vmul.f32 %v1105_v54, %v2403_v51  ;;  %v766_v60 = vrot.slane %v521_v0, 7  ;;  %v610_v15 = vpop.f32.mrf.mxu1 }
 0x18c   : > { %v882_v4 = vsel %vm880_vm2, %v877_v34, %v878_v59  ;;  %v1447_v6 = vadd.f32 %v2299_v19, %v1446_v1 }
 0x18d   : > { %v1006_v46 = vadd.f32 %v974_v63, %v882_v4  ;;  %v1169_v8 = vmul.f32 0.044715, %v1137_v2  ;;  %v799_v11 = vsel %vm767_vm1, %v766_v60, %v735_v33  ;;  %v768_v16 = vsel %vm767_vm1, %v765_v3, %v766_v60 }
 0x18e   : > { %1514 = vst.msk [vmem:[%s2308_s25 + $0x40] sm:$0xff] %vm386_vm0, %v1447_v6  ;;  %v800_v14 = vsel %vm719_vm4, %v2015_v27, %v799_v11  ;;  %v976_v36 = vadd.f32 %v768_v16, %v610_v15 }
 0x18f   : > { %v2422_v13 = vadd.f32 %v2362_v61, %v1006_v46  ;;  %v1201_v41 = vadd.f32 %v1169_v8, %v2403_v51  ;;  %v945_v33 = vadd.f32 %v800_v14, %v2017_v29  ;;  %v1327_v29 = vmul.f32 %v1295_v12, %v1071_v25 }
 0x190   : > { %v1073_v8 = vmul.f32 0.5, %v2403_v51  ;;  %v1046_v51 = vmul.f32 0.5, %v2388_v24 }
 0x191   : > { %v1878_v21 = vpop.eup %1877  ;;  %v699_v7 = vpop.f32.mrf.mxu2  ;;  %v1106_v27 = vmul.f32 %v2422_v13, %v2422_v13  ;;  %v977_v34 = vadd.f32 %v945_v33, %v2051_v47  ;;  %v1233_v39 = vmul.f32 0.7978846, %v1201_v41  ;;  %v1074_v10 = vmul.f32 0.5, %v2422_v13 }
 0x192   : > { %v879_v35 = vrot.slane %v699_v7, 1  ;;  %v1296_v37 = vadd.f32 1.0, %v1878_v21 }
 0x193   : > { %v1448_v22 = vpop.f32.mrf.mxu3  ;;  %v1138_v38 = vmul.f32 %v1106_v27, %v2422_v13  ;;  %v1013_v62 = vadd.f32 %v2362_v61, %v977_v34  ;;  %1879 = vtanh.f32 %v1233_v39 }
 0x194   : > { %v881_v17 = vsel %vm880_vm2, %v878_v59, %v879_v35  ;;  %v912_v47 = vsel %vm880_vm2, %v879_v35, %v848_v42  ;;  %v1449_v43 = vadd.f32 %v2299_v19, %v1448_v22  ;;  %v1328_v48 = vmul.f32 %v1296_v37, %v1072_v26 }
 0x195   : > { %v944_v57 = vsel %vm847_vm3, %v699_v7, %v912_v47  ;;  %v1007_v45 = vadd.f32 %v975_v23, %v881_v17  ;;  %v1170_v49 = vmul.f32 0.044715, %v1138_v38  ;;  %v1077_v50 = vmul.f32 %v1013_v62, %v1013_v62 }
 0x196   : > { %v1008_v56 = vadd.f32 %v976_v36, %v944_v57  ;;  %1515 = vst.msk [vmem:[%s2308_s25 + $0x48] sm:$0xff] %vm386_vm0, %v1449_v43  ;;  %v1346_v5 = vpack.c.bf16 %v1328_v48, %v1327_v29  ;;  %v1045_v7 = vmul.f32 0.5, %v1013_v62 }
 0x197   : > { %v1043_v31 = vadd.f32 %v2362_v61, %v1007_v45  ;;  %v1202_v32 = vadd.f32 %v1170_v49, %v2422_v13  ;;  %v1109_v42 = vmul.f32 %v1077_v50, %v1013_v62 }
 0x198   : > { %v1044_v30 = vadd.f32 %v2362_v61, %v1008_v56 }
 0x199   : > { %1490 = vmatmul.bf16.gmra.mxu3 %v1346_v5  ;;  %v1234_v44 = vmul.f32 0.7978846, %v1202_v32  ;;  %v1107_v53 = vmul.f32 %v1043_v31, %v1043_v31  ;;  %v1141_v9 = vmul.f32 0.044715, %v1109_v42  ;;  %v1880_v63 = vpop.eup %1879  ;;  %v1075_v22 = vmul.f32 0.5, %v1043_v31 }
 0x19a   : > { %v1108_v20 = vmul.f32 %v1044_v30, %v1044_v30  ;;  %v1297_v3 = vadd.f32 1.0, %v1880_v63  ;;  %v1076_v24 = vmul.f32 0.5, %v1044_v30 }
 0x19b   : > { %v1451_v55 = vpop.f32.mrf.mxu3  ;;  %1881 = vtanh.f32 %v1234_v44  ;;  %v1139_v58 = vmul.f32 %v1107_v53, %v1043_v31  ;;  %v1173_v40 = vadd.f32 %v1141_v9, %v1013_v62 }
 0x19c   : > { %v1140_v54 = vmul.f32 %v1108_v20, %v1044_v30  ;;  %v1452_v59 = vadd.f32 %v2299_v19, %v1451_v55  ;;  %1883 = vtanh.f32 %v1206_v52  ;;  %v1329_v16 = vmul.f32 %v1297_v3, %v1073_v8 }
 0x19d   : > { %v1171_v0 = vmul.f32 0.044715, %v1139_v58  ;;  %v1205_v61 = vmul.f32 0.7978846, %v1173_v40 }
 0x19e   : > { %1516 = vst.msk [vmem:[%s2308_s25 + $0x50] sm:$0xff] %vm386_vm0, %v1452_v59  ;;  %v1172_v1 = vmul.f32 0.044715, %v1140_v54 }
 0x19f   : > { %v1203_v2 = vadd.f32 %v1171_v0, %v1043_v31  ;;  %1885 = vtanh.f32 %v1205_v61 }
 0x1a0   : > { %v1204_v4 = vadd.f32 %v1172_v1, %v1044_v30 }
 0x1a1   : > { %v1882_v60 = vpop.eup %1881  ;;  %v1235_v6 = vmul.f32 0.7978846, %v1203_v2 }
 0x1a2   : > { %v1884_v46 = vpop.eup %1883  ;;  %v1298_v11 = vadd.f32 1.0, %v1882_v60  ;;  %v1236_v12 = vmul.f32 0.7978846, %v1204_v4 }
 0x1a3   : > { %v1453_v14 = vpop.f32.mrf.mxu3  ;;  %v1270_v18 = vadd.f32 1.0, %v1884_v46  ;;  %1887 = vtanh.f32 %v1235_v6 }
 0x1a4   : > { %v1454_v15 = vadd.f32 %v2299_v19, %v1453_v14  ;;  %v1330_v41 = vmul.f32 %v1298_v11, %v1074_v10  ;;  %1889 = vtanh.f32 %v1236_v12 }
 0x1a5   : > { %v1886_v33 = vpop.eup %1885  ;;  %v1302_v26 = vmul.f32 %v1270_v18, %v1046_v51 }
 0x1a6   : > { %1517 = vst.msk [vmem:[%s2308_s25 + $0x58] sm:$0xff] %vm386_vm0, %v1454_v15  ;;  %v1347_v21 = vpack.c.bf16 %v1330_v41, %v1329_v16  ;;  %v1269_v25 = vadd.f32 1.0, %v1886_v33 }
 0x1a8   : > { %v1301_v13 = vmul.f32 %v1269_v25, %v1045_v7 }
 0x1a9   : > { %1495 = vmatmul.bf16.gmra.mxu3 %v1347_v21  ;;  %v1888_v27 = vpop.eup %1887 }
 0x1aa   : > { %v1333_v34 = vpack.c.bf16 %v1302_v26, %v1301_v13  ;;  %v1890_v35 = vpop.eup %1889  ;;  %v1299_v37 = vadd.f32 1.0, %v1888_v27 }
 0x1ab   : > { %v1456_v28 = vpop.f32.mrf.mxu3  ;;  %v1300_v23 = vadd.f32 1.0, %v1890_v35 }
 0x1ac   : > { %v1457_v36 = vadd.f32 %v2299_v19, %v1456_v28  ;;  %1425 = vmatmul.bf16.vlgmr.msrb.gmra.mxu0 %v1333_v34  ;;  %v1331_v38 = vmul.f32 %v1299_v37, %v1075_v22 }
 0x1ad   : > { %v1332_v39 = vmul.f32 %v1300_v23, %v1076_v24 }
 0x1ae   : > { %1518 = vst.msk [vmem:[%s2308_s25 + $0x60] sm:$0xff] %vm386_vm0, %v1457_v36 }
 0x1af   : > { %v1348_v17 = vpack.c.bf16 %v1332_v39, %v1331_v38 }
 0x1b3   : > { %v1458_v29 = vpop.f32.mrf.mxu3 }
 0x1b4   : > { %v1459_v62 = vadd.f32 %v2299_v19, %v1458_v29 }
 0x1b6   : > { %1519 = vst.msk [vmem:[%s2308_s25 + $0x68] sm:$0xff] %vm386_vm0, %v1459_v62 }
 0x1b9   : > { %1500 = vmatmul.bf16.gmra.mxu3 %v1348_v17 }
 0x1bc   : > { %v1461_v47 = vpop.f32.mrf.mxu3 }
 0x1bd   : > { %v1462_v43 = vadd.f32 %v2299_v19, %v1461_v47 }
 0x1bf   : > { %1520 = vst.msk [vmem:[%s2308_s25 + $0x70] sm:$0xff] %vm386_vm0, %v1462_v43 }
 0x1c4   : > { %v1463_v57 = vpop.f32.mrf.mxu3 }
 0x1c5   : > { %v1464_v45 = vadd.f32 %v2299_v19, %v1463_v57 }
 0x1c7   : > { %1521 = vst.msk [vmem:[%s2308_s25 + $0x78] sm:$0xff] %vm386_vm0, %v1464_v45 }
 0x1cc   : > { %v1466_v48 = vpop.f32.mrf.mxu3 }
 0x1cd   : > { %v1467_v3 = vadd.f32 %v2299_v19, %v1466_v48 }
 0x1cf   : > { %1522 = vst.msk [vmem:[%s2308_s25 + $0x80] sm:$0xff] %vm386_vm0, %v1467_v3 }
 0x1d4   : > { %v1468_v49 = vpop.f32.mrf.mxu3 }
 0x1d5   : > { %v1469_v8 = vadd.f32 %v2299_v19, %v1468_v49 }
 0x1d7   : > { %1523 = vst.msk [vmem:[%s2308_s25 + $0x88] sm:$0xff] %vm386_vm0, %v1469_v8 }
 0x1dc   : > { %v1471_v56 = vpop.f32.mrf.mxu3 }
 0x1dd   : > { %v1472_v50 = vadd.f32 %v2299_v19, %v1471_v56 }
 0x1df   : > { %1524 = vst.msk [vmem:[%s2308_s25 + $0x90] sm:$0xff] %vm386_vm0, %v1472_v50 }
 0x1e4   : > { %v1473_v31 = vpop.f32.mrf.mxu3 }
 0x1e5   : > { %v1474_v5 = vadd.f32 %v2299_v19, %v1473_v31 }
 0x1e7   : > { %1525 = vst.msk [vmem:[%s2308_s25 + $0x98] sm:$0xff] %vm386_vm0, %v1474_v5 }
 0x1ec   : > { %v1476_v32 = vpop.f32.mrf.mxu3 }
 0x1ed   : > { %v1477_v30 = vadd.f32 %v2299_v19, %v1476_v32 }
 0x1ef   : > { %1526 = vst.msk [vmem:[%s2308_s25 + $0xa0] sm:$0xff] %vm386_vm0, %v1477_v30 }
 0x1f4   : > { %v1478_v42 = vpop.f32.mrf.mxu3 }
 0x1f5   : > { %v1479_v52 = vadd.f32 %v2299_v19, %v1478_v42 }
 0x1f7   : > { %1527 = vst.msk [vmem:[%s2308_s25 + $0xa8] sm:$0xff] %vm386_vm0, %v1479_v52 }
 0x1fc   : > { %v1481_v44 = vpop.f32.mrf.mxu3 }
 0x1fd   : > { %v1482_v53 = vadd.f32 %v2299_v19, %v1481_v44 }
 0x1ff   : > { %1528 = vst.msk [vmem:[%s2308_s25 + $0xb0] sm:$0xff] %vm386_vm0, %v1482_v53 }
 0x204   : > { %v1483_v20 = vpop.f32.mrf.mxu3 }
 0x205   : > { %v1484_v9 = vadd.f32 %v2299_v19, %v1483_v20 }
 0x207   : > { %1529 = vst.msk [vmem:[%s2308_s25 + $0xb8] sm:$0xff] %vm386_vm0, %v1484_v9 }
 0x20c   : > { %v1486_v55 = vpop.f32.mrf.mxu3 }
 0x20d   : > { %v1487_v58 = vadd.f32 %v2299_v19, %v1486_v55 }
 0x20f   : > { %1530 = vst.msk [vmem:[%s2308_s25 + $0xc0] sm:$0xff] %vm386_vm0, %v1487_v58 }
 0x214   : > { %v1488_v54 = vpop.f32.mrf.mxu3 }
 0x215   : > { %v1489_v59 = vadd.f32 %v2299_v19, %v1488_v54 }
 0x217   : > { %1531 = vst.msk [vmem:[%s2308_s25 + $0xc8] sm:$0xff] %vm386_vm0, %v1489_v59 }
 0x21c   : > { %v1491_v40 = vpop.f32.mrf.mxu3 }
 0x21d   : > { %v1492_v63 = vadd.f32 %v2299_v19, %v1491_v40 }
 0x21f   : > { %1532 = vst.msk [vmem:[%s2308_s25 + $0xd0] sm:$0xff] %vm386_vm0, %v1492_v63 }
 0x224   : > { %v1493_v0 = vpop.f32.mrf.mxu3 }
 0x225   : > { %v1494_v61 = vadd.f32 %v2299_v19, %v1493_v0 }
 0x227   : > { %1533 = vst.msk [vmem:[%s2308_s25 + $0xd8] sm:$0xff] %vm386_vm0, %v1494_v61 }
 0x229   : > { %v1426_v1 = vpop.f32.mrf.mxu0 }
 0x22a   : > { %v1427_v2 = vadd.f32 %v2299_v19, %v1426_v1 }
 0x22c   : > { %v1496_v4 = vpop.f32.mrf.mxu3  ;;  %1506 = vst.msk [vmem:[%s2308_s25] sm:$0xff] %vm386_vm0, %v1427_v2 }
 0x22d   : > { %v1497_v60 = vadd.f32 %v2299_v19, %v1496_v4 }
 0x22f   : > { %1534 = vst.msk [vmem:[%s2308_s25 + $0xe0] sm:$0xff] %vm386_vm0, %v1497_v60 }
 0x231   : > { %v1428_v6 = vpop.f32.mrf.mxu0 }
 0x232   : > { %v1429_v46 = vadd.f32 %v2299_v19, %v1428_v6 }
 0x234   : > { %v1498_v10 = vpop.f32.mrf.mxu3  ;;  %1507 = vst.msk [vmem:[%s2308_s25 + $0x8] sm:$0xff] %vm386_vm0, %v1429_v46 }
 0x235   : > { %v1499_v11 = vadd.f32 %v2299_v19, %v1498_v10 }
 0x237   : > { %1535 = vst.msk [vmem:[%s2308_s25 + $0xe8] sm:$0xff] %vm386_vm0, %v1499_v11 }
 0x23c   : > { %v1501_v12 = vpop.f32.mrf.mxu3 }
 0x23d   : > { %v1502_v14 = vadd.f32 %v2299_v19, %v1501_v12 }
 0x23f   : > { %1536 = vst.msk [vmem:[%s2308_s25 + $0xf0] sm:$0xff] %vm386_vm0, %v1502_v14 }
 0x244   : > { %v1503_v15 = vpop.f32.mrf.mxu3 }
 0x245   : > { %v1504_v16 = vadd.f32 %v2299_v19, %v1503_v15 }
 0x247   : > { %1537 = vst.msk [vmem:[%s2308_s25 + $0xf8] sm:$0xff] %vm386_vm0, %v1504_v16 }
 0x248 PF: > { %s15_s18 = sadd.s32 1, %s1898_s18  }
 0x249   : > { %p12_p4 = scmp.ge.s32.totalorder %s15_s18, 6  }
 0x24b   :  { %14 = sbr.rel (!%p12_p4) target bundleno = 1 (0x1), region = 70 }

</bundles_post_ra>
